<compile_context>
chip_gen: v5e
topology: v5e:2x2
jax: 0.10.0
libtpu: 0.0.40
codegen_flags: <defaults>
</compile_context>

<pallas_src>
import functools
import math

import jax
import jax.numpy as jnp
from jax.experimental import pallas as pl
from jax.experimental.pallas import tpu as pltpu


# ---------------------------------------------------------------------------
# Kernel helpers
# ---------------------------------------------------------------------------
def _layernorm(x, g, b, eps=1e-6):
    # Annotated-Transformer LayerNorm: a2 * (x - mean) / (std + eps) + b2,
    # with unbiased std (torch.Tensor.std default).  The divide is replaced by
    # an EUP reciprocal on the (S, 1) column (off the VALU slot).
    n = x.shape[-1]
    mean = jnp.mean(x, axis=-1, keepdims=True)
    var = jnp.sum((x - mean) ** 2, axis=-1, keepdims=True) / (n - 1)
    inv = pl.reciprocal(jnp.sqrt(var) + eps, approx=True)
    return g * (x - mean) * inv + b


# ---------------------------------------------------------------------------
# Pallas kernel: ONE encoder layer for ONE batch element per grid step.
# grid = (B, L); the residual stream is carried across the L axis in x_sc.
# ---------------------------------------------------------------------------
def encoder_layer_kernel(
    x_ref, bias_ref,
    ln1g_ref, ln1b_ref, wqkv_ref, bqkv_ref, wo_ref, bo_ref,
    ln2g_ref, ln2b_ref, w1_ref, b1_ref, w2_ref, b2_ref,
    o_ref,
    x_sc,
    *, n_heads,
):
    l = pl.program_id(1)
    n_layers = pl.num_programs(1)

    # Initialize the residual carry from the embedded input at the first layer.
    @pl.when(l == 0)
    def _():
        x_sc[...] = x_ref[0]

    x = x_sc[...]                               # (S, dm) f32 residual stream
    S, dm = x.shape
    H = n_heads
    dh = dm // H
    scale = 1.0 / math.sqrt(dh)

    bias = bias_ref[0]                          # (1, S): 0 valid / -1e9 masked

    # ---- Sublayer 1: pre-norm multi-head self-attention + residual --------
    xn = _layernorm(x, ln1g_ref[0], ln1b_ref[0])          # (S, dm) f32

    # Fused QKV projection: one (S, dm) x (dm, 3dm) bf16 matmul, f32 acc.
    qkv = jnp.dot(xn.astype(jnp.bfloat16), wqkv_ref[0],
                  preferred_element_type=jnp.float32) + bqkv_ref[0]   # (S, 3dm)
    q = qkv[:, 0:dm] * scale                    # fold 1/sqrt(dh): O(S*dm)
    k = qkv[:, dm:2 * dm]
    v = qkv[:, 2 * dm:3 * dm]

    # Batched heads (H, S, dh) from lane slices.
    # TODO(synk): at realistic dims (dh multiple of 128) build these with a
    # single lane-dense pltpu.einshape('q(hd)->hqd') instead of slice+stack.
    q3 = jnp.stack([q[:, h * dh:(h + 1) * dh] for h in range(H)], axis=0)
    k3 = jnp.stack([k[:, h * dh:(h + 1) * dh] for h in range(H)], axis=0)
    v3 = jnp.stack([v[:, h * dh:(h + 1) * dh] for h in range(H)], axis=0)

    # Scores for all heads in one batched einsum; mask bias broadcast
    # implicitly from (1, S) (no materialized (H, S, S) bias tensor).
    # TODO(synk): at realistic S, tile the key axis flash-style with online
    # max/sum instead of materializing the full (H, S, S) scores.
    scores = jnp.einsum('hqd,hkd->hqk',
                        q3.astype(jnp.bfloat16), k3.astype(jnp.bfloat16),
                        preferred_element_type=jnp.float32)           # (H, S, S)
    scores = scores + bias
    scores = scores - jnp.max(scores, axis=-1, keepdims=True)
    p = jnp.exp(scores)
    denom = jnp.sum(p, axis=-1, keepdims=True)                        # (H, S, 1)

    # Unnormalized PV matmul; normalize AFTER on the (H, S, dh) context.
    ctx = jnp.einsum('hqk,hkd->hqd',
                     p.astype(jnp.bfloat16), v3.astype(jnp.bfloat16),
                     preferred_element_type=jnp.float32)              # (H, S, dh)
    ctx = ctx * pl.reciprocal(denom, approx=True)                     # EUP slot

    # Output projection: accumulate per-head 2-D matmuls into ONE (S, dm) f32
    # accumulator (no (H, S, dm) intermediate, no separate head-sum pass).
    wo = wo_ref[0]                                                    # (H, dh, dm) bf16
    attn = jnp.dot(ctx[0].astype(jnp.bfloat16), wo[0],
                   preferred_element_type=jnp.float32)
    for h in range(1, H):
        attn = attn + jnp.dot(ctx[h].astype(jnp.bfloat16), wo[h],
                              preferred_element_type=jnp.float32)
    attn = attn + bo_ref[0]                                           # (S, dm)
    x = x + attn

    # ---- Sublayer 2: pre-norm position-wise feed-forward + residual -------
    xn2 = _layernorm(x, ln2g_ref[0], ln2b_ref[0])
    h1 = jnp.dot(xn2.astype(jnp.bfloat16), w1_ref[0],
                 preferred_element_type=jnp.float32) + b1_ref[0]      # (S, dff)
    h1 = jnp.maximum(h1, 0.0)
    ff = jnp.dot(h1.astype(jnp.bfloat16), w2_ref[0],
                 preferred_element_type=jnp.float32) + b2_ref[0]      # (S, dm)
    x = x + ff

    x_sc[...] = x

    # Write the output block only once, after the last layer.
    @pl.when(l == n_layers - 1)
    def _():
        # TODO(synk): at toy dm=32 this store is lane-masked; at realistic
        # dims keep dm a multiple of 128 for unmasked lane-dense stores.
        o_ref[0] = x.astype(o_ref.dtype)


# ---------------------------------------------------------------------------
# Wrapper: one pallas_call, grid = (batch, layers), layer weights streamed.
# ---------------------------------------------------------------------------
_PARAM_ORDER = ["ln1_g", "ln1_b", "wqkv", "bqkv", "wo_h", "bo",
                "ln2_g", "ln2_b", "w1", "b1", "w2", "b2"]


def _vmem_limit_bytes():
    # Leave headroom under the physical VMEM ceiling (review: don't set the
    # limit to v7x's entire 64 MiB; use the extra capacity on v5e/v6e).
    try:
        cap = pltpu.get_tpu_info().vmem_capacity_bytes
    except Exception:
        cap = 64 * 1024 * 1024
    return int(cap * 3 // 4)


def encoder_stack(x, mask_bias, params, n_heads):
    """x: (B, S, dm) f32; mask_bias: (B, 1, S) f32 additive bias."""
    B, S, dm = x.shape
    n_layers = params["wqkv"].shape[0]
    param_vals = [params[k] for k in _PARAM_ORDER]

    def layer_spec(a):
        # One layer's slice of the stacked weight, indexed by the l grid axis
        # (auto double-buffered -> streams layer l+1 while computing layer l).
        blk = (1,) + a.shape[1:]
        nd = a.ndim
        return pl.BlockSpec(blk, lambda b, l, _nd=nd: (l,) + (0,) * (_nd - 1))

    in_specs = [
        pl.BlockSpec((1, S, dm), lambda b, l: (b, 0, 0)),   # x (constant over l)
        pl.BlockSpec((1, 1, S), lambda b, l: (b, 0, 0)),    # mask bias
    ] + [layer_spec(a) for a in param_vals]

    kernel = functools.partial(encoder_layer_kernel, n_heads=n_heads)

    return pl.pallas_call(
        kernel,
        out_shape=jax.ShapeDtypeStruct((B, S, dm), jnp.float32),
        grid=(B, n_layers),
        in_specs=in_specs,
        out_specs=pl.BlockSpec((1, S, dm), lambda b, l: (b, 0, 0)),
        scratch_shapes=[pltpu.VMEM((S, dm), jnp.float32)],   # residual carry
        compiler_params=pltpu.CompilerParams(
            dimension_semantics=("parallel", "arbitrary"),
            vmem_limit_bytes=_vmem_limit_bytes()),
    )(x, mask_bias, *param_vals)


# ---------------------------------------------------------------------------
# Plain-JAX glue: embeddings, positional encoding, parameter init.
# ---------------------------------------------------------------------------
def sinusoidal_pe(max_len, dm):
    pos = jnp.arange(max_len, dtype=jnp.float32)[:, None]
    i = jnp.arange(0, dm, 2, dtype=jnp.float32)[None, :]
    div = jnp.exp(-i * (math.log(10000.0) / dm))
    pe = jnp.zeros((max_len, dm), jnp.float32)
    pe = pe.at[:, 0::2].set(jnp.sin(pos * div))
    pe = pe.at[:, 1::2].set(jnp.cos(pos * div))
    return pe  # (max_len, dm)


def init_params(key, din, dm, dff, n_heads, n_layers):
    dh = dm // n_heads
    k_emb, k_layers = jax.random.split(key)
    emb = jax.random.normal(k_emb, (din, dm), jnp.float32) * 0.02

    def dense(k, fan_in, fan_out):
        lim = 1.0 / math.sqrt(fan_in)
        return jax.random.uniform(k, (fan_in, fan_out), jnp.float32, -lim, lim)

    keys = jax.random.split(k_layers, n_layers)
    wqkv, wo_h, w1, w2 = [], [], [], []
    for li in range(n_layers):
        ks = jax.random.split(keys[li], 6)
        wq, wk, wv = dense(ks[0], dm, dm), dense(ks[1], dm, dm), dense(ks[2], dm, dm)
        wqkv.append(jnp.concatenate([wq, wk, wv], axis=1))           # (dm, 3dm)
        wo_h.append(dense(ks[3], dm, dm).reshape(n_heads, dh, dm))   # (H, dh, dm)
        w1.append(dense(ks[4], dm, dff))
        w2.append(dense(ks[5], dff, dm))

    L = n_layers
    # Weights (matmul operands) stored bf16; LN params / biases stay f32.
    # TODO(synk): on v5e/v6e the big matrices could be int8 + f32 scale for 2x
    # MXU throughput; not portable to v7x (no integer MXU path), so kept bf16.
    return {
        "emb": emb,
        "ln1_g": jnp.ones((L, 1, dm), jnp.float32),
        "ln1_b": jnp.zeros((L, 1, dm), jnp.float32),
        "wqkv": jnp.stack(wqkv).astype(jnp.bfloat16),
        "bqkv": jnp.zeros((L, 1, 3 * dm), jnp.float32),
        "wo_h": jnp.stack(wo_h).astype(jnp.bfloat16),
        "bo": jnp.zeros((L, 1, dm), jnp.float32),
        "ln2_g": jnp.ones((L, 1, dm), jnp.float32),
        "ln2_b": jnp.zeros((L, 1, dm), jnp.float32),
        "w1": jnp.stack(w1).astype(jnp.bfloat16),
        "b1": jnp.zeros((L, 1, dff), jnp.float32),
        "w2": jnp.stack(w2).astype(jnp.bfloat16),
        "b2": jnp.zeros((L, 1, dm), jnp.float32),
    }


def encoder_forward(src_seq, src_mask, params, dm, n_heads, max_seq_len):
    B, S = src_seq.shape
    # TODO(synk): token-id embedding gather + PE add stay in plain JAX (data-
    # dependent gather); could move in-kernel with scalar-prefetch Element specs.
    x = jnp.take(params["emb"], src_seq, axis=0) * math.sqrt(dm)     # (B, S, dm)
    x = x + sinusoidal_pe(max_seq_len, dm)[None, :S, :]
    # emb_dropout / sublayer dropouts are identity in eval mode.
    mask_bias = ((1.0 - src_mask.astype(jnp.float32)) * (-1e9)).reshape(B, 1, S)
    return encoder_stack(x, mask_bias, params, n_heads)


# ---------------------------------------------------------------------------
if __name__ == "__main__":
    din, dm, dff, n_heads, n_enc_layers, max_seq_len = 20, 32, 64, 4, 2, 16
    B, S = 2, 8

    key = jax.random.PRNGKey(0)
    k_tok, k_par = jax.random.split(key)

    src_seq = jax.random.randint(k_tok, (B, S), 0, din, dtype=jnp.int32)
    # mask: 1 = valid token, 0 = padding (last two keys of batch 1 padded)
    src_mask = jnp.ones((B, S), jnp.float32).at[1, -2:].set(0.0)

    params = init_params(k_par, din, dm, dff, n_heads, n_enc_layers)

    out = encoder_forward(src_seq, src_mask, params, dm, n_heads, max_seq_len)
    out = jax.block_until_ready(out)
    assert out.shape == (B, S, dm)
    assert bool(jnp.all(jnp.isfinite(out)))
    print("KERNEL_OK")
</pallas_src>

<mosaic_0001>
module attributes {stable_mosaic.version = 11 : i64} {
  func.func @encoder_layer_kernel(%arg0: i32, %arg1: i32, %arg2: memref<1x8x32xf32, #tpu.memory_space<vmem>>, %arg3: memref<1x1x8xf32, #tpu.memory_space<vmem>>, %arg4: memref<1x1x32xf32, #tpu.memory_space<vmem>>, %arg5: memref<1x1x32xf32, #tpu.memory_space<vmem>>, %arg6: memref<1x32x96xbf16, #tpu.memory_space<vmem>>, %arg7: memref<1x1x96xf32, #tpu.memory_space<vmem>>, %arg8: memref<1x4x8x32xbf16, #tpu.memory_space<vmem>>, %arg9: memref<1x1x32xf32, #tpu.memory_space<vmem>>, %arg10: memref<1x1x32xf32, #tpu.memory_space<vmem>>, %arg11: memref<1x1x32xf32, #tpu.memory_space<vmem>>, %arg12: memref<1x32x64xbf16, #tpu.memory_space<vmem>>, %arg13: memref<1x1x64xf32, #tpu.memory_space<vmem>>, %arg14: memref<1x64x32xbf16, #tpu.memory_space<vmem>>, %arg15: memref<1x1x32xf32, #tpu.memory_space<vmem>>, %arg16: memref<1x8x32xf32, #tpu.memory_space<vmem>>, %arg17: memref<8x32xf32, #tpu.memory_space<vmem>>) attributes {dimension_semantics = [#tpu.dimension_semantics<parallel>, #tpu.dimension_semantics<arbitrary>], iteration_bounds = array<i64: 2, 2>, scalar_prefetch = 0 : i64, scratch_operands = 1 : i64, tpu.core_type = #tpu.core_type<tc>, window_params = [{transform_indices = @transform_0, window_bounds = array<i64: 1, 8, 32>}, {transform_indices = @transform_1, window_bounds = array<i64: 1, 1, 8>}, {transform_indices = @transform_2, window_bounds = array<i64: 1, 1, 32>}, {transform_indices = @transform_3, window_bounds = array<i64: 1, 1, 32>}, {transform_indices = @transform_4, window_bounds = array<i64: 1, 32, 96>}, {transform_indices = @transform_5, window_bounds = array<i64: 1, 1, 96>}, {transform_indices = @transform_6, window_bounds = array<i64: 1, 4, 8, 32>}, {transform_indices = @transform_7, window_bounds = array<i64: 1, 1, 32>}, {transform_indices = @transform_8, window_bounds = array<i64: 1, 1, 32>}, {transform_indices = @transform_9, window_bounds = array<i64: 1, 1, 32>}, {transform_indices = @transform_10, window_bounds = array<i64: 1, 32, 64>}, {transform_indices = @transform_11, window_bounds = array<i64: 1, 1, 64>}, {transform_indices = @transform_12, window_bounds = array<i64: 1, 64, 32>}, {transform_indices = @transform_13, window_bounds = array<i64: 1, 1, 32>}, {transform_indices = @transform_14, window_bounds = array<i64: 1, 8, 32>}]} {
    %c0_i32 = arith.constant 0 : i32
    %0 = arith.cmpi eq, %arg1, %c0_i32 : i32
    %1 = arith.extui %0 : i1 to i32
    %c0_i32_0 = arith.constant 0 : i32
    %2 = arith.cmpi ne, %1, %c0_i32_0 : i32
    scf.if %2 {
      %c0_67 = arith.constant 0 : index
      %c0_68 = arith.constant 0 : index
      %c0_69 = arith.constant 0 : index
      %176 = vector.load %arg2[%c0_67, %c0_68, %c0_69] : memref<1x8x32xf32, #tpu.memory_space<vmem>>, vector<1x8x32xf32>
      %177 = vector.shape_cast %176 : vector<1x8x32xf32> to vector<8x32xf32>
      %c0_70 = arith.constant 0 : index
      %c0_71 = arith.constant 0 : index
      %178 = vector.load %arg17[%c0_70, %c0_71] : memref<8x32xf32, #tpu.memory_space<vmem>>, vector<8x32xf32>
      tpu.vector_store %arg17[%c0_70, %c0_71], %177 {strides = array<i32>} : memref<8x32xf32, #tpu.memory_space<vmem>>, vector<8x32xf32>,
    } else {
    }
    %c0 = arith.constant 0 : index
    %c0_1 = arith.constant 0 : index
    %3 = vector.load %arg17[%c0, %c0_1] : memref<8x32xf32, #tpu.memory_space<vmem>>, vector<8x32xf32>
    %c0_2 = arith.constant 0 : index
    %c0_3 = arith.constant 0 : index
    %c0_4 = arith.constant 0 : index
    %4 = vector.load %arg3[%c0_2, %c0_3, %c0_4] : memref<1x1x8xf32, #tpu.memory_space<vmem>>, vector<1x1x8xf32>
    %5 = vector.shape_cast %4 : vector<1x1x8xf32> to vector<1x8xf32>
    %c0_5 = arith.constant 0 : index
    %c0_6 = arith.constant 0 : index
    %c0_7 = arith.constant 0 : index
    %6 = vector.load %arg4[%c0_5, %c0_6, %c0_7] : memref<1x1x32xf32, #tpu.memory_space<vmem>>, vector<1x1x32xf32>
    %7 = vector.shape_cast %6 : vector<1x1x32xf32> to vector<1x32xf32>
    %c0_8 = arith.constant 0 : index
    %c0_9 = arith.constant 0 : index
    %c0_10 = arith.constant 0 : index
    %8 = vector.load %arg5[%c0_8, %c0_9, %c0_10] : memref<1x1x32xf32, #tpu.memory_space<vmem>>, vector<1x1x32xf32>
    %9 = vector.shape_cast %8 : vector<1x1x32xf32> to vector<1x32xf32>
    %cst = arith.constant dense<0.000000e+00> : vector<8xf32>
    %10 = vector.multi_reduction <add>, %3, %cst [1] : vector<8x32xf32> to vector<8xf32>
    %11 = vector.shape_cast %10 : vector<8xf32> to vector<8x1xf32>
    %cst_11 = arith.constant 3.200000e+01 : f32
    %12 = vector.broadcast %cst_11 : f32 to vector<8x1xf32>
    %13 = arith.divf %11, %12 : vector<8x1xf32>
    %14 = vector.broadcast %13 : vector<8x1xf32> to vector<8x32xf32>
    %15 = arith.subf %3, %14 : vector<8x32xf32>
    %16 = arith.mulf %15, %15 : vector<8x32xf32>
    %cst_12 = arith.constant dense<0.000000e+00> : vector<8xf32>
    %17 = vector.multi_reduction <add>, %16, %cst_12 [1] : vector<8x32xf32> to vector<8xf32>
    %18 = vector.shape_cast %17 : vector<8xf32> to vector<8x1xf32>
    %cst_13 = arith.constant 3.100000e+01 : f32
    %19 = vector.broadcast %cst_13 : f32 to vector<8x1xf32>
    %20 = arith.divf %18, %19 : vector<8x1xf32>
    %21 = math.sqrt %20 : vector<8x1xf32>
    %cst_14 = arith.constant 9.99999997E-7 : f32
    %22 = vector.broadcast %cst_14 : f32 to vector<8x1xf32>
    %23 = arith.addf %21, %22 : vector<8x1xf32>
    %24 = tpu.reciprocal %23 {approx = true} : vector<8x1xf32> -> vector<8x1xf32>
    %25 = vector.broadcast %13 : vector<8x1xf32> to vector<8x32xf32>
    %26 = arith.subf %3, %25 : vector<8x32xf32>
    %27 = vector.broadcast %7 : vector<1x32xf32> to vector<8x32xf32>
    %28 = arith.mulf %27, %26 : vector<8x32xf32>
    %29 = vector.broadcast %24 : vector<8x1xf32> to vector<8x32xf32>
    %30 = arith.mulf %28, %29 : vector<8x32xf32>
    %31 = vector.broadcast %9 : vector<1x32xf32> to vector<8x32xf32>
    %32 = arith.addf %30, %31 : vector<8x32xf32>
    %33 = arith.truncf %32 : vector<8x32xf32> to vector<8x32xbf16>
    %c0_15 = arith.constant 0 : index
    %c0_16 = arith.constant 0 : index
    %c0_17 = arith.constant 0 : index
    %34 = vector.load %arg6[%c0_15, %c0_16, %c0_17] : memref<1x32x96xbf16, #tpu.memory_space<vmem>>, vector<1x32x96xbf16>
    %35 = vector.shape_cast %34 : vector<1x32x96xbf16> to vector<32x96xbf16>
    %cst_18 = arith.constant dense<0.000000e+00> : vector<8x96xf32>
    %36 = tpu.matmul %33, %35, %cst_18 {dimension_numbers = #tpu.dot_dimension_numbers<[1], [0], [0], [1], [0, 0, 1, 1], [], []>} : vector<8x32xbf16>, vector<32x96xbf16>, vector<8x96xf32> -> vector<8x96xf32>
    %c0_19 = arith.constant 0 : index
    %c0_20 = arith.constant 0 : index
    %c0_21 = arith.constant 0 : index
    %37 = vector.load %arg7[%c0_19, %c0_20, %c0_21] : memref<1x1x96xf32, #tpu.memory_space<vmem>>, vector<1x1x96xf32>
    %38 = vector.shape_cast %37 : vector<1x1x96xf32> to vector<1x96xf32>
    %39 = vector.broadcast %38 : vector<1x96xf32> to vector<8x96xf32>
    %40 = arith.addf %36, %39 : vector<8x96xf32>
    %41 = vector.extract_strided_slice %40 {offsets = [0, 0], sizes = [8, 32], strides = [1, 1]} : vector<8x96xf32> to vector<8x32xf32>
    %cst_22 = arith.constant 0.353553385 : f32
    %42 = vector.broadcast %cst_22 : f32 to vector<8x32xf32>
    %43 = arith.mulf %41, %42 : vector<8x32xf32>
    %44 = vector.extract_strided_slice %40 {offsets = [0, 32], sizes = [8, 32], strides = [1, 1]} : vector<8x96xf32> to vector<8x32xf32>
    %45 = vector.extract_strided_slice %40 {offsets = [0, 64], sizes = [8, 32], strides = [1, 1]} : vector<8x96xf32> to vector<8x32xf32>
    %46 = vector.extract_strided_slice %43 {offsets = [0, 0], sizes = [8, 8], strides = [1, 1]} : vector<8x32xf32> to vector<8x8xf32>
    %47 = vector.extract_strided_slice %43 {offsets = [0, 8], sizes = [8, 8], strides = [1, 1]} : vector<8x32xf32> to vector<8x8xf32>
    %48 = vector.extract_strided_slice %43 {offsets = [0, 16], sizes = [8, 8], strides = [1, 1]} : vector<8x32xf32> to vector<8x8xf32>
    %49 = vector.extract_strided_slice %43 {offsets = [0, 24], sizes = [8, 8], strides = [1, 1]} : vector<8x32xf32> to vector<8x8xf32>
    %50 = vector.shape_cast %46 : vector<8x8xf32> to vector<1x8x8xf32>
    %51 = vector.shape_cast %47 : vector<8x8xf32> to vector<1x8x8xf32>
    %52 = vector.shape_cast %48 : vector<8x8xf32> to vector<1x8x8xf32>
    %53 = vector.shape_cast %49 : vector<8x8xf32> to vector<1x8x8xf32>
    %54 = tpu.concatenate %50, %51, %52, %53 in 0 : vector<1x8x8xf32>, vector<1x8x8xf32>, vector<1x8x8xf32>, vector<1x8x8xf32> -> vector<4x8x8xf32>
    %55 = vector.extract_strided_slice %44 {offsets = [0, 0], sizes = [8, 8], strides = [1, 1]} : vector<8x32xf32> to vector<8x8xf32>
    %56 = vector.extract_strided_slice %44 {offsets = [0, 8], sizes = [8, 8], strides = [1, 1]} : vector<8x32xf32> to vector<8x8xf32>
    %57 = vector.extract_strided_slice %44 {offsets = [0, 16], sizes = [8, 8], strides = [1, 1]} : vector<8x32xf32> to vector<8x8xf32>
    %58 = vector.extract_strided_slice %44 {offsets = [0, 24], sizes = [8, 8], strides = [1, 1]} : vector<8x32xf32> to vector<8x8xf32>
    %59 = vector.shape_cast %55 : vector<8x8xf32> to vector<1x8x8xf32>
    %60 = vector.shape_cast %56 : vector<8x8xf32> to vector<1x8x8xf32>
    %61 = vector.shape_cast %57 : vector<8x8xf32> to vector<1x8x8xf32>
    %62 = vector.shape_cast %58 : vector<8x8xf32> to vector<1x8x8xf32>
    %63 = tpu.concatenate %59, %60, %61, %62 in 0 : vector<1x8x8xf32>, vector<1x8x8xf32>, vector<1x8x8xf32>, vector<1x8x8xf32> -> vector<4x8x8xf32>
    %64 = vector.extract_strided_slice %45 {offsets = [0, 0], sizes = [8, 8], strides = [1, 1]} : vector<8x32xf32> to vector<8x8xf32>
    %65 = vector.extract_strided_slice %45 {offsets = [0, 8], sizes = [8, 8], strides = [1, 1]} : vector<8x32xf32> to vector<8x8xf32>
    %66 = vector.extract_strided_slice %45 {offsets = [0, 16], sizes = [8, 8], strides = [1, 1]} : vector<8x32xf32> to vector<8x8xf32>
    %67 = vector.extract_strided_slice %45 {offsets = [0, 24], sizes = [8, 8], strides = [1, 1]} : vector<8x32xf32> to vector<8x8xf32>
    %68 = vector.shape_cast %64 : vector<8x8xf32> to vector<1x8x8xf32>
    %69 = vector.shape_cast %65 : vector<8x8xf32> to vector<1x8x8xf32>
    %70 = vector.shape_cast %66 : vector<8x8xf32> to vector<1x8x8xf32>
    %71 = vector.shape_cast %67 : vector<8x8xf32> to vector<1x8x8xf32>
    %72 = tpu.concatenate %68, %69, %70, %71 in 0 : vector<1x8x8xf32>, vector<1x8x8xf32>, vector<1x8x8xf32>, vector<1x8x8xf32> -> vector<4x8x8xf32>
    %73 = arith.truncf %54 : vector<4x8x8xf32> to vector<4x8x8xbf16>
    %74 = arith.truncf %63 : vector<4x8x8xf32> to vector<4x8x8xbf16>
    "tpu.trace_start"() <{level = 10 : i32, message = "hqd,hkd->hqk"}> : () -> ()
    %cst_23 = arith.constant dense<0.000000e+00> : vector<4x8x8xf32>
    %75 = tpu.matmul %73, %74, %cst_23 {dimension_numbers = #tpu.dot_dimension_numbers<[2], [2], [1], [1], [0, 0, 0, 1, 1, 1], [0], [0]>} : vector<4x8x8xbf16>, vector<4x8x8xbf16>, vector<4x8x8xf32> -> vector<4x8x8xf32>
    "tpu.trace_stop"() : () -> ()
    %76 = vector.shape_cast %5 : vector<1x8xf32> to vector<1x1x8xf32>
    %77 = vector.broadcast %76 : vector<1x1x8xf32> to vector<4x8x8xf32>
    %78 = arith.addf %75, %77 : vector<4x8x8xf32>
    %cst_24 = arith.constant dense<0xFF800000> : vector<4x8xf32>
    %79 = vector.multi_reduction <maximumf>, %78, %cst_24 [2] : vector<4x8x8xf32> to vector<4x8xf32>
    %80 = vector.shape_cast %79 : vector<4x8xf32> to vector<4x8x1xf32>
    %81 = vector.broadcast %80 : vector<4x8x1xf32> to vector<4x8x8xf32>
    %82 = arith.subf %78, %81 : vector<4x8x8xf32>
    %83 = math.exp %82 : vector<4x8x8xf32>
    %cst_25 = arith.constant dense<0.000000e+00> : vector<4x8xf32>
    %84 = vector.multi_reduction <add>, %83, %cst_25 [2] : vector<4x8x8xf32> to vector<4x8xf32>
    %85 = vector.shape_cast %84 : vector<4x8xf32> to vector<4x8x1xf32>
    %86 = arith.truncf %83 : vector<4x8x8xf32> to vector<4x8x8xbf16>
    %87 = arith.truncf %72 : vector<4x8x8xf32> to vector<4x8x8xbf16>
    "tpu.trace_start"() <{level = 10 : i32, message = "hqk,hkd->hqd"}> : () -> ()
    %cst_26 = arith.constant dense<0.000000e+00> : vector<4x8x8xf32>
    %88 = tpu.matmul %86, %87, %cst_26 {dimension_numbers = #tpu.dot_dimension_numbers<[2], [1], [1], [2], [0, 0, 0, 1, 1, 2], [0], [0]>} : vector<4x8x8xbf16>, vector<4x8x8xbf16>, vector<4x8x8xf32> -> vector<4x8x8xf32>
    "tpu.trace_stop"() : () -> ()
    %89 = tpu.reciprocal %85 {approx = true} : vector<4x8x1xf32> -> vector<4x8x1xf32>
    %90 = vector.broadcast %89 : vector<4x8x1xf32> to vector<4x8x8xf32>
    %91 = arith.mulf %88, %90 : vector<4x8x8xf32>
    %c0_27 = arith.constant 0 : index
    %c0_28 = arith.constant 0 : index
    %c0_29 = arith.constant 0 : index
    %c0_30 = arith.constant 0 : index
    %92 = vector.load %arg8[%c0_27, %c0_28, %c0_29, %c0_30] : memref<1x4x8x32xbf16, #tpu.memory_space<vmem>>, vector<1x4x8x32xbf16>
    %93 = vector.shape_cast %92 : vector<1x4x8x32xbf16> to vector<4x8x32xbf16>
    %94 = vector.extract_strided_slice %91 {offsets = [0, 0, 0], sizes = [1, 8, 8], strides = [1, 1, 1]} : vector<4x8x8xf32> to vector<1x8x8xf32>
    %95 = vector.shape_cast %94 : vector<1x8x8xf32> to vector<8x8xf32>
    %96 = arith.truncf %95 : vector<8x8xf32> to vector<8x8xbf16>
    %97 = vector.extract_strided_slice %93 {offsets = [0, 0, 0], sizes = [1, 8, 32], strides = [1, 1, 1]} : vector<4x8x32xbf16> to vector<1x8x32xbf16>
    %98 = vector.shape_cast %97 : vector<1x8x32xbf16> to vector<8x32xbf16>
    %cst_31 = arith.constant dense<0.000000e+00> : vector<8x32xf32>
    %99 = tpu.matmul %96, %98, %cst_31 {dimension_numbers = #tpu.dot_dimension_numbers<[1], [0], [0], [1], [0, 0, 1, 1], [], []>} : vector<8x8xbf16>, vector<8x32xbf16>, vector<8x32xf32> -> vector<8x32xf32>
    %100 = vector.extract_strided_slice %91 {offsets = [1, 0, 0], sizes = [1, 8, 8], strides = [1, 1, 1]} : vector<4x8x8xf32> to vector<1x8x8xf32>
    %101 = vector.shape_cast %100 : vector<1x8x8xf32> to vector<8x8xf32>
    %102 = arith.truncf %101 : vector<8x8xf32> to vector<8x8xbf16>
    %103 = vector.extract_strided_slice %93 {offsets = [1, 0, 0], sizes = [1, 8, 32], strides = [1, 1, 1]} : vector<4x8x32xbf16> to vector<1x8x32xbf16>
    %104 = vector.shape_cast %103 : vector<1x8x32xbf16> to vector<8x32xbf16>
    %cst_32 = arith.constant dense<0.000000e+00> : vector<8x32xf32>
    %105 = tpu.matmul %102, %104, %cst_32 {dimension_numbers = #tpu.dot_dimension_numbers<[1], [0], [0], [1], [0, 0, 1, 1], [], []>} : vector<8x8xbf16>, vector<8x32xbf16>, vector<8x32xf32> -> vector<8x32xf32>
    %106 = arith.addf %99, %105 : vector<8x32xf32>
    %107 = vector.extract_strided_slice %91 {offsets = [2, 0, 0], sizes = [1, 8, 8], strides = [1, 1, 1]} : vector<4x8x8xf32> to vector<1x8x8xf32>
    %108 = vector.shape_cast %107 : vector<1x8x8xf32> to vector<8x8xf32>
    %109 = arith.truncf %108 : vector<8x8xf32> to vector<8x8xbf16>
    %110 = vector.extract_strided_slice %93 {offsets = [2, 0, 0], sizes = [1, 8, 32], strides = [1, 1, 1]} : vector<4x8x32xbf16> to vector<1x8x32xbf16>
    %111 = vector.shape_cast %110 : vector<1x8x32xbf16> to vector<8x32xbf16>
    %cst_33 = arith.constant dense<0.000000e+00> : vector<8x32xf32>
    %112 = tpu.matmul %109, %111, %cst_33 {dimension_numbers = #tpu.dot_dimension_numbers<[1], [0], [0], [1], [0, 0, 1, 1], [], []>} : vector<8x8xbf16>, vector<8x32xbf16>, vector<8x32xf32> -> vector<8x32xf32>
    %113 = arith.addf %106, %112 : vector<8x32xf32>
    %114 = vector.extract_strided_slice %91 {offsets = [3, 0, 0], sizes = [1, 8, 8], strides = [1, 1, 1]} : vector<4x8x8xf32> to vector<1x8x8xf32>
    %115 = vector.shape_cast %114 : vector<1x8x8xf32> to vector<8x8xf32>
    %116 = arith.truncf %115 : vector<8x8xf32> to vector<8x8xbf16>
    %117 = vector.extract_strided_slice %93 {offsets = [3, 0, 0], sizes = [1, 8, 32], strides = [1, 1, 1]} : vector<4x8x32xbf16> to vector<1x8x32xbf16>
    %118 = vector.shape_cast %117 : vector<1x8x32xbf16> to vector<8x32xbf16>
    %cst_34 = arith.constant dense<0.000000e+00> : vector<8x32xf32>
    %119 = tpu.matmul %116, %118, %cst_34 {dimension_numbers = #tpu.dot_dimension_numbers<[1], [0], [0], [1], [0, 0, 1, 1], [], []>} : vector<8x8xbf16>, vector<8x32xbf16>, vector<8x32xf32> -> vector<8x32xf32>
    %120 = arith.addf %113, %119 : vector<8x32xf32>
    %c0_35 = arith.constant 0 : index
    %c0_36 = arith.constant 0 : index
    %c0_37 = arith.constant 0 : index
    %121 = vector.load %arg9[%c0_35, %c0_36, %c0_37] : memref<1x1x32xf32, #tpu.memory_space<vmem>>, vector<1x1x32xf32>
    %122 = vector.shape_cast %121 : vector<1x1x32xf32> to vector<1x32xf32>
    %123 = vector.broadcast %122 : vector<1x32xf32> to vector<8x32xf32>
    %124 = arith.addf %120, %123 : vector<8x32xf32>
    %125 = arith.addf %3, %124 : vector<8x32xf32>
    %c0_38 = arith.constant 0 : index
    %c0_39 = arith.constant 0 : index
    %c0_40 = arith.constant 0 : index
    %126 = vector.load %arg10[%c0_38, %c0_39, %c0_40] : memref<1x1x32xf32, #tpu.memory_space<vmem>>, vector<1x1x32xf32>
    %127 = vector.shape_cast %126 : vector<1x1x32xf32> to vector<1x32xf32>
    %c0_41 = arith.constant 0 : index
    %c0_42 = arith.constant 0 : index
    %c0_43 = arith.constant 0 : index
    %128 = vector.load %arg11[%c0_41, %c0_42, %c0_43] : memref<1x1x32xf32, #tpu.memory_space<vmem>>, vector<1x1x32xf32>
    %129 = vector.shape_cast %128 : vector<1x1x32xf32> to vector<1x32xf32>
    %cst_44 = arith.constant dense<0.000000e+00> : vector<8xf32>
    %130 = vector.multi_reduction <add>, %125, %cst_44 [1] : vector<8x32xf32> to vector<8xf32>
    %131 = vector.shape_cast %130 : vector<8xf32> to vector<8x1xf32>
    %cst_45 = arith.constant 3.200000e+01 : f32
    %132 = vector.broadcast %cst_45 : f32 to vector<8x1xf32>
    %133 = arith.divf %131, %132 : vector<8x1xf32>
    %134 = vector.broadcast %133 : vector<8x1xf32> to vector<8x32xf32>
    %135 = arith.subf %125, %134 : vector<8x32xf32>
    %136 = arith.mulf %135, %135 : vector<8x32xf32>
    %cst_46 = arith.constant dense<0.000000e+00> : vector<8xf32>
    %137 = vector.multi_reduction <add>, %136, %cst_46 [1] : vector<8x32xf32> to vector<8xf32>
    %138 = vector.shape_cast %137 : vector<8xf32> to vector<8x1xf32>
    %cst_47 = arith.constant 3.100000e+01 : f32
    %139 = vector.broadcast %cst_47 : f32 to vector<8x1xf32>
    %140 = arith.divf %138, %139 : vector<8x1xf32>
    %141 = math.sqrt %140 : vector<8x1xf32>
    %cst_48 = arith.constant 9.99999997E-7 : f32
    %142 = vector.broadcast %cst_48 : f32 to vector<8x1xf32>
    %143 = arith.addf %141, %142 : vector<8x1xf32>
    %144 = tpu.reciprocal %143 {approx = true} : vector<8x1xf32> -> vector<8x1xf32>
    %145 = vector.broadcast %133 : vector<8x1xf32> to vector<8x32xf32>
    %146 = arith.subf %125, %145 : vector<8x32xf32>
    %147 = vector.broadcast %127 : vector<1x32xf32> to vector<8x32xf32>
    %148 = arith.mulf %147, %146 : vector<8x32xf32>
    %149 = vector.broadcast %144 : vector<8x1xf32> to vector<8x32xf32>
    %150 = arith.mulf %148, %149 : vector<8x32xf32>
    %151 = vector.broadcast %129 : vector<1x32xf32> to vector<8x32xf32>
    %152 = arith.addf %150, %151 : vector<8x32xf32>
    %153 = arith.truncf %152 : vector<8x32xf32> to vector<8x32xbf16>
    %c0_49 = arith.constant 0 : index
    %c0_50 = arith.constant 0 : index
    %c0_51 = arith.constant 0 : index
    %154 = vector.load %arg12[%c0_49, %c0_50, %c0_51] : memref<1x32x64xbf16, #tpu.memory_space<vmem>>, vector<1x32x64xbf16>
    %155 = vector.shape_cast %154 : vector<1x32x64xbf16> to vector<32x64xbf16>
    %cst_52 = arith.constant dense<0.000000e+00> : vector<8x64xf32>
    %156 = tpu.matmul %153, %155, %cst_52 {dimension_numbers = #tpu.dot_dimension_numbers<[1], [0], [0], [1], [0, 0, 1, 1], [], []>} : vector<8x32xbf16>, vector<32x64xbf16>, vector<8x64xf32> -> vector<8x64xf32>
    %c0_53 = arith.constant 0 : index
    %c0_54 = arith.constant 0 : index
    %c0_55 = arith.constant 0 : index
    %157 = vector.load %arg13[%c0_53, %c0_54, %c0_55] : memref<1x1x64xf32, #tpu.memory_space<vmem>>, vector<1x1x64xf32>
    %158 = vector.shape_cast %157 : vector<1x1x64xf32> to vector<1x64xf32>
    %159 = vector.broadcast %158 : vector<1x64xf32> to vector<8x64xf32>
    %160 = arith.addf %156, %159 : vector<8x64xf32>
    %cst_56 = arith.constant 0.000000e+00 : f32
    %161 = vector.broadcast %cst_56 : f32 to vector<8x64xf32>
    %162 = arith.maximumf %160, %161 : vector<8x64xf32>
    %163 = arith.truncf %162 : vector<8x64xf32> to vector<8x64xbf16>
    %c0_57 = arith.constant 0 : index
    %c0_58 = arith.constant 0 : index
    %c0_59 = arith.constant 0 : index
    %164 = vector.load %arg14[%c0_57, %c0_58, %c0_59] : memref<1x64x32xbf16, #tpu.memory_space<vmem>>, vector<1x64x32xbf16>
    %165 = vector.shape_cast %164 : vector<1x64x32xbf16> to vector<64x32xbf16>
    %cst_60 = arith.constant dense<0.000000e+00> : vector<8x32xf32>
    %166 = tpu.matmul %163, %165, %cst_60 {dimension_numbers = #tpu.dot_dimension_numbers<[1], [0], [0], [1], [0, 0, 1, 1], [], []>} : vector<8x64xbf16>, vector<64x32xbf16>, vector<8x32xf32> -> vector<8x32xf32>
    %c0_61 = arith.constant 0 : index
    %c0_62 = arith.constant 0 : index
    %c0_63 = arith.constant 0 : index
    %167 = vector.load %arg15[%c0_61, %c0_62, %c0_63] : memref<1x1x32xf32, #tpu.memory_space<vmem>>, vector<1x1x32xf32>
    %168 = vector.shape_cast %167 : vector<1x1x32xf32> to vector<1x32xf32>
    %169 = vector.broadcast %168 : vector<1x32xf32> to vector<8x32xf32>
    %170 = arith.addf %166, %169 : vector<8x32xf32>
    %171 = arith.addf %125, %170 : vector<8x32xf32>
    %c0_64 = arith.constant 0 : index
    %c0_65 = arith.constant 0 : index
    %172 = vector.load %arg17[%c0_64, %c0_65] : memref<8x32xf32, #tpu.memory_space<vmem>>, vector<8x32xf32>
    tpu.vector_store %arg17[%c0_64, %c0_65], %171 {strides = array<i32>} : memref<8x32xf32, #tpu.memory_space<vmem>>, vector<8x32xf32>,
    %c1_i32 = arith.constant 1 : i32
    %173 = arith.cmpi eq, %arg1, %c1_i32 : i32
    %174 = arith.extui %173 : i1 to i32
    %c0_i32_66 = arith.constant 0 : i32
    %175 = arith.cmpi ne, %174, %c0_i32_66 : i32
    scf.if %175 {
      %c0_67 = arith.constant 0 : index
      %c0_68 = arith.constant 0 : index
      %c0_69 = arith.constant 0 : index
      %176 = vector.load %arg16[%c0_67, %c0_68, %c0_69] : memref<1x8x32xf32, #tpu.memory_space<vmem>>, vector<1x8x32xf32>
      %177 = vector.shape_cast %176 : vector<1x8x32xf32> to vector<8x32xf32>
      %178 = vector.shape_cast %171 : vector<8x32xf32> to vector<1x8x32xf32>
      tpu.vector_store %arg16[%c0_67, %c0_68, %c0_69], %178 {strides = array<i32>} : memref<1x8x32xf32, #tpu.memory_space<vmem>>, vector<1x8x32xf32>,
    } else {
    }
    return
  }
  func.func @transform_0(%arg0: i32, %arg1: i32) -> (i32, i32, i32) {
    %c0_i32 = arith.constant 0 : i32
    %c0_i32_0 = arith.constant 0 : i32
    %c0_i32_1 = arith.constant 0 : i32
    return %arg0, %c0_i32, %c0_i32_0 : i32, i32, i32
  }
  func.func @transform_1(%arg0: i32, %arg1: i32) -> (i32, i32, i32) {
    %c0_i32 = arith.constant 0 : i32
    %c0_i32_0 = arith.constant 0 : i32
    %c0_i32_1 = arith.constant 0 : i32
    return %arg0, %c0_i32, %c0_i32_0 : i32, i32, i32
  }
  func.func @transform_2(%arg0: i32, %arg1: i32) -> (i32, i32, i32) {
    %c0_i32 = arith.constant 0 : i32
    %c0_i32_0 = arith.constant 0 : i32
    %c0_i32_1 = arith.constant 0 : i32
    return %arg1, %c0_i32, %c0_i32_0 : i32, i32, i32
  }
  func.func @transform_3(%arg0: i32, %arg1: i32) -> (i32, i32, i32) {
    %c0_i32 = arith.constant 0 : i32
    %c0_i32_0 = arith.constant 0 : i32
    %c0_i32_1 = arith.constant 0 : i32
    return %arg1, %c0_i32, %c0_i32_0 : i32, i32, i32
  }
  func.func @transform_4(%arg0: i32, %arg1: i32) -> (i32, i32, i32) {
    %c0_i32 = arith.constant 0 : i32
    %c0_i32_0 = arith.constant 0 : i32
    %c0_i32_1 = arith.constant 0 : i32
    return %arg1, %c0_i32, %c0_i32_0 : i32, i32, i32
  }
  func.func @transform_5(%arg0: i32, %arg1: i32) -> (i32, i32, i32) {
    %c0_i32 = arith.constant 0 : i32
    %c0_i32_0 = arith.constant 0 : i32
    %c0_i32_1 = arith.constant 0 : i32
    return %arg1, %c0_i32, %c0_i32_0 : i32, i32, i32
  }
  func.func @transform_6(%arg0: i32, %arg1: i32) -> (i32, i32, i32, i32) {
    %c0_i32 = arith.constant 0 : i32
    %c0_i32_0 = arith.constant 0 : i32
    %c0_i32_1 = arith.constant 0 : i32
    %c0_i32_2 = arith.constant 0 : i32
    return %arg1, %c0_i32, %c0_i32_0, %c0_i32_1 : i32, i32, i32, i32
  }
  func.func @transform_7(%arg0: i32, %arg1: i32) -> (i32, i32, i32) {
    %c0_i32 = arith.constant 0 : i32
    %c0_i32_0 = arith.constant 0 : i32
    %c0_i32_1 = arith.constant 0 : i32
    return %arg1, %c0_i32, %c0_i32_0 : i32, i32, i32
  }
  func.func @transform_8(%arg0: i32, %arg1: i32) -> (i32, i32, i32) {
    %c0_i32 = arith.constant 0 : i32
    %c0_i32_0 = arith.constant 0 : i32
    %c0_i32_1 = arith.constant 0 : i32
    return %arg1, %c0_i32, %c0_i32_0 : i32, i32, i32
  }
  func.func @transform_9(%arg0: i32, %arg1: i32) -> (i32, i32, i32) {
    %c0_i32 = arith.constant 0 : i32
    %c0_i32_0 = arith.constant 0 : i32
    %c0_i32_1 = arith.constant 0 : i32
    return %arg1, %c0_i32, %c0_i32_0 : i32, i32, i32
  }
  func.func @transform_10(%arg0: i32, %arg1: i32) -> (i32, i32, i32) {
    %c0_i32 = arith.constant 0 : i32
    %c0_i32_0 = arith.constant 0 : i32
    %c0_i32_1 = arith.constant 0 : i32
    return %arg1, %c0_i32, %c0_i32_0 : i32, i32, i32
  }
  func.func @transform_11(%arg0: i32, %arg1: i32) -> (i32, i32, i32) {
    %c0_i32 = arith.constant 0 : i32
    %c0_i32_0 = arith.constant 0 : i32
    %c0_i32_1 = arith.constant 0 : i32
    return %arg1, %c0_i32, %c0_i32_0 : i32, i32, i32
  }
  func.func @transform_12(%arg0: i32, %arg1: i32) -> (i32, i32, i32) {
    %c0_i32 = arith.constant 0 : i32
    %c0_i32_0 = arith.constant 0 : i32
    %c0_i32_1 = arith.constant 0 : i32
    return %arg1, %c0_i32, %c0_i32_0 : i32, i32, i32
  }
  func.func @transform_13(%arg0: i32, %arg1: i32) -> (i32, i32, i32) {
    %c0_i32 = arith.constant 0 : i32
    %c0_i32_0 = arith.constant 0 : i32
    %c0_i32_1 = arith.constant 0 : i32
    return %arg1, %c0_i32, %c0_i32_0 : i32, i32, i32
  }
  func.func @transform_14(%arg0: i32, %arg1: i32) -> (i32, i32, i32) {
    %c0_i32 = arith.constant 0 : i32
    %c0_i32_0 = arith.constant 0 : i32
    %c0_i32_1 = arith.constant 0 : i32
    return %arg0, %c0_i32, %c0_i32_0 : i32, i32, i32
  }
}

</mosaic_0001>

<bundles_post_ra>
// kernel: tpu_custom_call.1
= control target key start
LH: loop header
LB: loop body
LE: loop exit
PB: predicated region body
PF: predicated region fallthrough
CT: control target
= control target key end

     0   :  { %s2677_s0 = inlined_call_operand.hbm [shape: f32[2,8,32], index: 0, kind: input, shape index: {}]   ;;  %s2678_s1 = inlined_call_operand.hbm [shape: f32[2,1,8], index: 1, kind: input, shape index: {}]   ;;  %s2679_s2 = inlined_call_operand.hbm [shape: f32[2,1,32], index: 2, kind: input, shape index: {}]   ;;  %s2680_s3 = inlined_call_operand.hbm [shape: f32[2,1,32], index: 3, kind: input, shape index: {}]   ;;  %s2681_s4 = inlined_call_operand.vmem [shape: bf16[2,32,96], index: 4, kind: input, shape index: {}]   ;;  %s2682_s5 = inlined_call_operand.vmem [shape: f32[2,1,96], index: 5, kind: input, shape index: {}]   ;;  %s2683_s6 = inlined_call_operand.vmem [shape: bf16[2,4,8,32], index: 6, kind: input, shape index: {}]   ;;  %s2684_s7 = inlined_call_operand.vmem [shape: f32[2,1,32], index: 7, kind: input, shape index: {}]   ;;  %s2685_s8 = inlined_call_operand.vmem [shape: f32[2,1,32], index: 8, kind: input, shape index: {}]   ;;  %s2686_s9 = inlined_call_operand.hbm [shape: f32[2,1,32], index: 9, kind: input, shape index: {}]   ;;  %s2687_s10 = inlined_call_operand.vmem [shape: bf16[2,32,64], index: 10, kind: input, shape index: {}]   ;;  %s2688_s11 = inlined_call_operand.vmem [shape: f32[2,1,64], index: 11, kind: input, shape index: {}]   ;;  %s2689_s12 = inlined_call_operand.vmem [shape: bf16[2,64,32], index: 12, kind: input, shape index: {}]   ;;  %s2690_s13 = inlined_call_operand.vmem [shape: f32[2,1,32], index: 13, kind: input, shape index: {}]   ;;  %s2691_s14 = inlined_call_operand.hbm [shape: f32[2,8,32], index: 14, kind: output, shape index: {}]  }
   0x1   :  { %2710 = sst [smem:[#allocation33_spill]] %s2677_s0 }
   0x2   :  { %2711 = sst [smem:[#allocation34_spill]] %s2678_s1 }
   0x3   :  { %2712 = sst [smem:[#allocation35_spill]] %s2679_s2 }
   0x4   :  { %2713 = sst [smem:[#allocation36_spill]] %s2680_s3 }
   0x5   :  { %2714 = sst [smem:[#allocation37_spill]] %s2681_s4 }
   0x6   :  { %2715 = sst [smem:[#allocation38_spill]] %s2682_s5 }
   0x7   :  { %2716 = sst [smem:[#allocation39_spill]] %s2683_s6 }
   0x8   :  { %2717 = sst [smem:[#allocation40_spill]] %s2684_s7 }
   0x9   :  { %2718 = sst [smem:[#allocation41_spill]] %s2685_s8 }
   0xa   :  { %2719 = sst [smem:[#allocation42_spill]] %s2686_s9 }
   0xb   :  { %2720 = sst [smem:[#allocation43_spill]] %s2687_s10 }
   0xc   :  { %2721 = sst [smem:[#allocation44_spill]] %s2688_s11 }
   0xd   :  { %2722 = sst [smem:[#allocation45_spill]] %s2689_s12 }
   0xe   :  { %2723 = sst [smem:[#allocation46_spill]] %s2690_s13 }
   0xf   :  { %2724 = sst [smem:[#allocation47_spill]] %s2691_s14 }
  0x10   :  { %19 = vsyncpa [#allocation4], 0 }
  0x11   :  { %21 = vsyncpa [#allocation4 + $0x1], 0 }
  0x12   :  { %22 = vsyncpa [#allocation7], 0 }
  0x13   :  { %24 = vsyncpa [#allocation7 + $0x1], 0 }
  0x14   :  { %25 = vsyncpa [#allocation10], 0 }
  0x15   :  { %27 = vsyncpa [#allocation10 + $0x1], 0 }
  0x16   :  { %28 = vsyncpa [#allocation5], 0 }
  0x17   :  { %30 = vsyncpa [#allocation5 + $0x1], 0  ;;  %s2242_s29 = smov 0   ;;  %s2244_s30 = smov 0  }
  0x18   :  { %s2246_s15 = smov 0   ;;  %s2248_s16 = smov 0  }
  0x19   :  { %s2250_s17 = smov 0   ;;  %s2252_s18 = smov 0  }
  0x1a   :  { %s2254_s19 = smov 0   ;;  %s2256_s20 = smov 0  }
  0x1b   :  { %s2258_s21 = smov 0   ;;  %s2260_s22 = smov 0  }
  0x1c   :  { %s2262_s23 = smov 0  }
  0x1d LB: > { %2725 = sst [smem:[#allocation18_spill]] %s2126_s15  ;;  %s2298_s24 = sadd.s32 4294967295, %s2158_s23   ;;  %s2158_s23 = sphi %s2262_s23, %s36_s23   ;;  %s2154_s22 = sphi %s2260_s22, %s2795_s22   ;;  %s2150_s21 = sphi %s2258_s21, %s2794_s21   ;;  %s2146_s20 = sphi %s2256_s20, %s2793_s20   ;;  %s2142_s19 = sphi %s2254_s19, %s2792_s19   ;;  %s2138_s18 = sphi %s2252_s18, %s2791_s18   ;;  %s2134_s17 = sphi %s2250_s17, %s2790_s17   ;;  %s2130_s16 = sphi %s2248_s16, %s2789_s16   ;;  %s2126_s15 = sphi %s2246_s15, %s2788_s15   ;;  %s2122_s30 = sphi %s2244_s30, %s2797_s30   ;;  %s2118_s29 = sphi %s2242_s29, %s2796_s29  }
  0x1e   : > { %2726 = sst [smem:[#allocation19_spill]] %s2130_s16  ;;  %s1627_s25 = sadd.s32 4294967294, %s2158_s23  }
  0x1f   : > { %2727 = sst [smem:[#allocation20_spill]] %s2134_s17  ;;  %p62_p0 = scmp.ne.s32.totalorder %s2138_s18, %s2134_s17 }
  0x20   : > { %2728 = sst [smem:[#allocation21_spill]] %s2138_s18  ;;  %p63_p1 = scmp.eq.s32.totalorder %s2158_s23, 0 }
  0x21   : > { %2729 = sst [smem:[#allocation22_spill]] %s2142_s19  ;;  %p68_p2 = scmp.ne.s32.totalorder %s2134_s17, %s2130_s16 }
  0x22   : > { %2730 = sst [smem:[#allocation23_spill]] %s2146_s20  ;;  %p69_p3 = scmp.eq.s32.totalorder %s2298_s24, 0 }
  0x23   : > { %2731 = sst [smem:[#allocation24_spill]] %s2150_s21  ;;  %p64_p4 = por %p63_p1, %p62_p0 }
  0x24   : > { %2732 = sst [smem:[#allocation25_spill]] %s2154_s22  ;;  %p430_p5 = scmp.eq.s32.totalorder %s2298_s24, 3 }
  0x25   : > { %p2314_p6 = por %p69_p3, %p68_p2  ;;  %p436_p7 = scmp.eq.s32.totalorder %s1627_s25, 3 }
  0x26   : > { %p2318_p8 = por %p430_p5, %p62_p0  ;;  %p2697_p10 = scmp.lt.s32.totalorder %s2158_s23, 4 }
  0x27   : > { %p2322_p9 = por %p436_p7, %p68_p2  ;;  %s2328_s16 = sand.u32 1, %s2138_s18  }
  0x28   : > { %s2734_s26 = scalar_select %p2318_p8, 1, 0 }
  0x29   : > { %s2736_s27 = scalar_select %p2322_p9, 1, 0 }
  0x2a   : > { %2735 = sst [smem:[#allocation26_spill]] %s2734_s26  ;;  %p2333_p11 = pnand %p2697_p10, %p64_p4 }
  0x2b   : > { %2737 = sst [smem:[#allocation27_spill]] %s2736_s27  ;;  %s478_s14 = scalar_lea.vmem [#allocation6], %s2328_s16 }
  0x2c   : > { %s2739_s1 = sld [smem:[#allocation34_spill]]  ;;  %s485_s13 = sshll.u32 %s478_s14, 4  ;;  %s486_s13 = int_to_ptr.vmem [resolvable:$true] %s485_s13 }
  0x2d   : > { %p1632_p12 = scmp.ge.s32.totalorder %s2158_s23, 1  ;;  %s2740_s11 = sand.u32 1, %s2158_s23  }
  0x2e   : > { %s2345_s10 = scalar_lea.sflag [#allocation7], %s2740_s11  ;;  %p603_p13 = scmp.lt.s32.totalorder %s2158_s23, 5 }
  0x2f   : > { %s45_s26 = sadd.s32 1, %s2150_s21  ;;  %s107_s14 = sadd.s32 1, %s2126_s15 }
  0x30   : > { %p2351_p0 = pnand %p1632_p12, %p603_p13  ;;  %p46_p2 = scmp.ge.s32.totalorder %s45_s26, 2 }
  0x31   : > { %p114_p4 = scmp.ne.s32.totalorder %s2126_s15, %s2122_s30  ;;  %p120_p5 = scmp.ne.s32.totalorder %s2122_s30, %s2118_s29 }
  0x32   : > { %s481_s27 = scalar_lea.hbm %s2739_s1, %s2154_s22  ;;  %s2362_s11 = sand.u32 1, %s2126_s15  }
  0x33   : > { %s483_s12 = sshll.u32 %s481_s27, 4  ;;  %s2799_s26 = smov (%p46_p2, %s45_s26), 0  ;;  %s484_s12 = int_to_ptr.hbm [resolvable:$true] %s483_s12 }
  0x34   : > { %1726 = dma.hbm_to_vmem [thread:$0]  (!%p2333_p11), %s484_s12, 16, %s486_s13, %s2345_s10  }
  0x35   : > { %2742 = sst [smem:[#allocation28_spill]] %s2799_s26  ;;  %s2743_s12 = sadd.s32 1, %s2154_s22 }
  0x36   : > { %s2801_s12 = smov (!%p46_p2, %s2743_s12), %s2154_s22  ;;  %s104_s13 = ssub.s32 %s2150_s21, %s2799_s26 }
  0x37   : > { %p116_p7 = por %p114_p4, %p63_p1  ;;  %p50_p12 = scmp.ge.s32.totalorder %s2801_s12, 2 }
  0x38   : > { %p105_p13 = scmp.eq.s32.totalorder %s104_s13, 0  ;;  %p2375_p10 = por %p120_p5, %p69_p3 }
  0x39   : > { %p2746_p9 = scmp.lt.s32.totalorder %s2158_s23, 4  ;;  %s2803_s12 = smov (%p50_p12, %s2801_s12), 0 }
  0x3a   : > { %s2744_s27 = scalar_select %p2375_p10, 1, 0 }
  0x3b   : > { %p2381_p8 = pnand %p2746_p9, %p116_p7  ;;  %2748 = sst [smem:[#allocation30_spill]] %s2803_s12 }
  0x3c   : > { %2745 = sst [smem:[#allocation29_spill]] %s2744_s27  ;;  %s52_s26 = ssub.s32 %s2154_s22, %s2803_s12 }
  0x3d   : > { %s2388_s1 = scalar_select %p105_p13, %s2126_s15, %s107_s14  }
  0x3e   : > { %p53_p1 = scmp.eq.s32.totalorder %s52_s26, 0  ;;  %s2750_s3 = sld [smem:[#allocation36_spill]] }
  0x3f   : > { %2749 = sst [smem:[#allocation31_spill]] %s2388_s1  ;;  %s2751_s6 = sadd.s32 1, %s2138_s18 }
  0x40   : > { %s2399_s4 = scalar_select %p53_p1, %s2138_s18, %s2751_s6  }
  0x41   : > { %s512_s19 = scalar_lea.vmem [#allocation9], %s2362_s11  ;;  %s2753_s14 = sand.u32 1, %s2158_s23  }
  0x42   : > { %2752 = sst [smem:[#allocation32_spill]] %s2399_s4  ;;  %s519_s27 = sshll.u32 %s512_s19, 4  ;;  %s520_s27 = int_to_ptr.vmem [resolvable:$true] %s519_s27 }
  0x43   : > { %s510_s1 = scalar_lea.sflag [#allocation10], %s2753_s14  ;;  %s1630_s26 = sshll.u32 %s2328_s16, 3 }
  0x44   : > { %s515_s7 = scalar_lea.hbm %s2750_s3, %s2150_s21  ;;  %s1631_s8 = sshll.u32 %s2154_s22, 3 }
  0x45   : > { %s517_s5 = sshll.u32 %s515_s7, 4  ;;  %s2754_s0 = sld [smem:[#allocation33_spill]]  ;;  %s518_s5 = int_to_ptr.hbm [resolvable:$true] %s517_s5 }
  0x46   : > { %1732 = dma.hbm_to_vmem [thread:$0]  (!%p2381_p8), %s518_s5, 16, %s520_s27, %s510_s1  }
  0x47   : > { %s460_s3 = scalar_lea.vmem [#allocation3], %s1630_s26  ;;  %s457_s4 = scalar_lea.sflag [#allocation4], %s2328_s16 }
  0x48   : > { %s468_s12 = sshll.u32 %s460_s3, 4  ;;  %s2755_s2 = sld [smem:[#allocation35_spill]]  ;;  %s469_s12 = int_to_ptr.vmem [resolvable:$true] %s468_s12 }
  0x49   : > { %s495_s22 = scalar_lea.vmem [#allocation8], %s2362_s11  ;;  %s2756_s9 = sld [smem:[#allocation42_spill]] }
  0x4a   : > { %s502_s18 = sshll.u32 %s495_s22, 4  ;;  %s563_s13 = scalar_lea.vmem [#allocation11], %s2362_s11  ;;  %s503_s18 = int_to_ptr.vmem [resolvable:$true] %s502_s18 }
  0x4b   : > { %s464_s7 = scalar_lea.hbm %s2754_s0, %s1631_s8  ;;  %s570_s6 = sshll.u32 %s563_s13, 4  ;;  %s571_s6 = int_to_ptr.vmem [resolvable:$true] %s570_s6 }
  0x4c   : > { %s466_s19 = sshll.u32 %s464_s7, 4  ;;  %s467_s19 = int_to_ptr.hbm [resolvable:$true] %s466_s19 }
  0x4d   : > { %1723 = dma.hbm_to_vmem [thread:$0]  (!%p2333_p11), %s467_s19, 128, %s469_s12, %s457_s4  }
  0x4e   : > { %s498_s14 = scalar_lea.hbm %s2755_s2, %s2150_s21  ;;  %607 = sbr.rel (%p2351_p0) target bundleno = 1904 (0x770), region = 76 }
  0x4f   : > { %s500_s15 = sshll.u32 %s498_s14, 4  ;;  %s566_s8 = scalar_lea.hbm %s2756_s9, %s2150_s21  ;;  %s501_s15 = int_to_ptr.hbm [resolvable:$true] %s500_s15 }
  0x50   : > { %1729 = dma.hbm_to_vmem [thread:$0]  (!%p2381_p8), %s501_s15, 16, %s503_s18, %s2345_s10  }
  0x51   : > { %s568_s16 = sshll.u32 %s566_s8, 4  ;;  %s2432_s4 = sand.u32 (!%p2351_p0), 1, %s2134_s17   ;;  %s569_s16 = int_to_ptr.hbm [resolvable:$true] %s568_s16 }
  0x52   : > { %1735 = dma.hbm_to_vmem [thread:$0]  (!%p2381_p8), %s569_s16, 16, %s571_s6, %s510_s1  }
  0x53   : > { %s2707_s10 = sshll.u32 %s2432_s4, 3  ;;  %s610_s15 = scalar_lea.sflag [#allocation4], %s2432_s4 }
  0x54   : > { %s2438_s18 = scalar_lea.vmem [#allocation3], %s2707_s10 }
  0x55   : > { %2097 = dma.done.wait (%p2314_p6), %s610_s15, 128  }
  0x56   : > { %2099 = vsyncadd (%p2314_p6), %s610_s15, 4294967168  ;;  %s619_s1 = sand.u32 1, %s2298_s24  }
  0x57   : > { %s620_s22 = scalar_lea.sflag [#allocation7], %s619_s1 }
  0x58   : > { %2101 = dma.done.wait (%p2314_p6), %s620_s22, 16  }
  0x59   : > { %2103 = vsyncadd (%p2314_p6), %s620_s22, 4294967280  ;;  %s2451_s11 = sand.u32 1, %s2122_s30  }
  0x5a   : > { %2105 = dma.done.wait (%p2375_p10), %s620_s22, 16  }
  0x5b   : > { %2107 = vsyncadd (%p2375_p10), %s620_s22, 4294967280  ;;  %s638_s24 = scalar_lea.sflag [#allocation10], %s619_s1 }
  0x5c   : > { %2109 = dma.done.wait (%p2375_p10), %s638_s24, 32  }
  0x5d   : > { %2111 = vsyncadd (%p2375_p10), %s638_s24, 4294967264  ;;  %s2758_s28 = sld [smem:[#allocation22_spill]]  ;;  %s2768_s10 = sshll.u32 %s2432_s4, 3 }
  0x5e   : > { %s2760_s13 = sld [smem:[#allocation37_spill]]  ;;  %s2512_s12 = scalar_lea.vmem [#allocation12], %s2768_s10 }
  0x5f   : > { %s2761_s1 = sld [smem:[#allocation39_spill]] }
  0x60   : > { %s2763_s0 = sld [smem:[#allocation41_spill]] }
  0x61   : > { %s2764_s14 = sld [smem:[#allocation43_spill]] }
  0x62   : > { %s2766_s21 = sld [smem:[#allocation46_spill]] }
  0x63   : > { %p746_p3 = scmp.lt.s32.totalorder %s2758_s28, 1  ;;  %s2767_s24 = sld [smem:[#allocation45_spill]] }
  0x64   : > { %p1643_p6 = scmp.ne.s32.totalorder %s2758_s28, 0 }
  0x65   : > { %s2465_s7 = scalar_select %p746_p3, %s2758_s28, 1 }
  0x67   : > { %s1696_s19 = sshll.u32 %s2465_s7, 4  ;;  %s764_s2 = scalar_lea.vmem %s2763_s0, %s2465_s7 }
  0x68   : > { %s2475_s6 = scalar_lea.vmem %s2760_s13, %s1696_s19  ;;  %s2480_s22 = scalar_lea.vmem %s2761_s1, %s1696_s19 }
  0x69   : > { %s2493_s26 = scalar_lea.vmem %s2764_s14, %s1696_s19  ;;  %s2765_s13 = sld [smem:[#allocation44_spill]] }
  0x6a   : > { %s1699_s16 = sshll.u32 %s2465_s7, 5  ;;  %s780_s17 = scalar_lea.vmem %s2766_s21, %s2465_s7 }
  0x6b   : > { %s2507_s29 = scalar_lea.vmem %s2767_s24, %s1699_s16  ;;  %s649_s0 = scalar_lea.vmem [#allocation11], %s2451_s11 }
  0x6c   : > { %785 = sbr.rel (%p1643_p6) target bundleno = 115 (0x73), region = 100 }
  0x6f   : > { %s772_s9 = scalar_lea.vmem %s2765_s13, %s2465_s7 }
  0x71   : > { %v786_v0 = vld [vmem:[%s2438_s18] sm:$0xff]  ;;  %vm787_vm0 = vcmask 261120  }
  0x72   : > { %788 = vst.msk [vmem:[#allocation2] sm:$0xff] %vm787_vm0, %v786_v0 }
  0x73 PF: > { %vm793_vm1 = vcmask 261120   ;;  %v2160_v3 = vmov 32.0   ;;  %v2161_v15 = vmov 31.0   ;;  %v1701_v16 = vld [vmem:[%s2475_s6 + $0x8] sm:$0xff]  ;;  %v1700_v18 = vld [vmem:[%s2475_s6] sm:$0xff]  ;;  %s2769_s21 = scalar_lea.vmem [#allocation8], %s2451_s11 }
  0x74   : > { %1846 = vrcp.f32 %v2160_v3  ;;  %871 = vmatpush.bf16.msra.mxu0 %v1701_v16  ;;  %v1837_v37 = vld [vmem:[%s2769_s21] ss:$0 sm:$0xff]  ;;  %s2770_s18 = scalar_lea.vmem [#allocation9], %s2451_s11  ;;  %s2771_s6 = sld [smem:[#allocation38_spill]]  ;;  %vm915_vm6 = vcmask 64512   ;;  %vm1052_vm7 = vcmask 1043456  }
  0x75   : > { %1848 = vrcp.f32 %v2161_v15  ;;  %v1838_v39 = vld [vmem:[%s2770_s18] ss:$0 sm:$0xff]  ;;  %s2162_s27 = smov 104   ;;  %s2163_s14 = smov 112   ;;  %vm1342_vm10 = vcmask 523264  }
  0x76   : > { %s2164_s3 = smov 120   ;;  %s2165_s8 = smov 96  }
  0x77   : > { %s2166_s13 = smov 64   ;;  %s2773_s16 = scalar_lea.vmem [#allocation6], %s2432_s4 }
  0x78   : > { %872 = vmatpush.bf16.msra.mxu0 %v1700_v18  ;;  %s2774_s1 = sld [smem:[#allocation40_spill]] }
  0x79   : > { %v2516_v1 = vld [vmem:[#allocation2] sm:$0xff] }
  0x7a   : > { %v794_v2 = vsel %vm793_vm1, %v2516_v1, 0.0  ;;  %v1847_v4 = vpop.eup %1846  ;;  %s2772_s5 = scalar_lea.vmem %s2771_s6, %s2465_s7 }
  0x7b   : > { %795 = vadd.xlane.f32.xlu0 %v794_v2  ;;  %v798_v5 = vmul.f32 32.0, %v1847_v4  ;;  %vm802_vm2 = vweird.f32 %v1847_v4  ;;  %v1849_v17 = vpop.eup %1848  ;;  %v1839_v44 = vld [vmem:[%s2772_s5] ss:$0 sm:$0xff] }
  0x7c   : > { %v811_v19 = vmul.f32 31.0, %v1849_v17  ;;  %vm815_vm3 = vweird.f32 %v1849_v17 }
  0x7d   : > { %v799_v6 = vsub.f32 1.0, %v798_v5 }
  0x7e   : > { %v812_v20 = vsub.f32 1.0, %v811_v19  ;;  %v1840_v19 = vld [vmem:[%s2773_s16] ss:$0 sm:$0xff]  ;;  %s2775_s20 = scalar_lea.vmem %s2774_s1, %s2465_s7 }
  0x7f   : > { %v800_v7 = vmul.f32 %v1847_v4, %v799_v6 }
  0x80   : > { %v813_v21 = vmul.f32 %v1849_v17, %v812_v20 }
  0x81   : > { %v801_v8 = vadd.f32 %v1847_v4, %v800_v7 }
  0x82   : > { %v814_v22 = vadd.f32 %v1849_v17, %v813_v21 }
  0x83   : > { %v2520_v9 = vsel %vm802_vm2, %v1847_v4, %v801_v8 }
  0x84   : > { %v2527_v23 = vsel %vm815_vm3, %v1849_v17, %v814_v22 }
  0xee   : > { %v796_v10 = vpop.xlane.xlu0 %795 }
  0xef   : > { %v804_v11 = vmul.f32 %v2520_v9, %v796_v10 }
  0xf1   : > { %v805_v12 = vsub.f32 %v2516_v1, %v804_v11 }
  0xf3   : > { %v806_v13 = vmul.f32 %v805_v12, %v805_v12  ;;  %v835_v38 = vmul.f32 %v1837_v37, %v805_v12 }
  0xf5   : > { %v807_v14 = vsel %vm793_vm1, %v806_v13, 0.0 }
  0xf6   : > { %808 = vadd.xlane.f32.xlu0 %v807_v14 }
 0x169   : > { %v809_v24 = vpop.xlane.xlu0 %808 }
 0x16a   : > { %v817_v25 = vmul.f32 %v2527_v23, %v809_v24 }
 0x16c   : > { %1850 = vrsqrt.f32 %v817_v25  ;;  %vm825_vm4 = vcmp.eq.f32.partialorder %v817_v25, inf  ;;  %v828_v33 = vand.u32 2147483648, %v817_v25  ;;  %vm827_vm5 = vcmp.eq.f32.partialorder %v817_v25, 0.0 }
 0x172   : > { %v1851_v26 = vpop.eup %1850 }
 0x173   : > { %v819_v27 = vmul.f32 %v1851_v26, %v817_v25 }
 0x175   : > { %v820_v28 = vmul.f32 %v1851_v26, %v819_v27 }
 0x177   : > { %v821_v29 = vmul.f32 0.5, %v820_v28 }
 0x179   : > { %v822_v30 = vsub.f32 1.5, %v821_v29 }
 0x17b   : > { %v823_v31 = vmul.f32 %v1851_v26, %v822_v30 }
 0x17d   : > { %v824_v32 = vmul.f32 %v823_v31, %v817_v25 }
 0x17f   : > { %v826_v34 = vsel %vm825_vm4, %v817_v25, %v824_v32 }
 0x180   : > { %v829_v35 = vsel %vm827_vm5, %v828_v33, %v826_v34 }
 0x181   : > { %v830_v36 = vadd.f32 1e-06, %v829_v35 }
 0x183   : > { %1852 = vrcp.f32 %v830_v36 }
 0x189   : > { %v1853_v40 = vpop.eup %1852 }
 0x18a   : > { %v836_v41 = vmul.f32 %v1853_v40, %v835_v38 }
 0x18c   : > { %v840_v42 = vadd.f32 %v1838_v39, %v836_v41 }
 0x18e   : > { %v841_v43 = vpack.c.bf16 %v840_v42, %v840_v42 }
 0x190   : > { %1652 = vmatmul.msk.bf16.vlgmr.msra.gmra.mxu0 %vm793_vm1, %v841_v43 }
 0x20d   : > { %v874_v45 = vpop.f32.mrf.mxu0 }
 0x20e   : > { %v875_v46 = vadd.f32 %v1839_v44, %v874_v45 }
 0x210   : > { %896 = vrot.lane.b32.xlu2 %v875_v46, %s2162_s27  ;;  %893 = vrot.lane.b32.xlu1 %v875_v46, %s2163_s14  ;;  %v878_v48 = vmul.f32 0.35355338, %v875_v46  ;;  %v903_v49 = vpack.c.bf16 %v875_v46, %v875_v46 }
 0x212   : > { %v911_v50 = vunpack.c.l.b16 %v903_v49  ;;  %v899_v4 = vpack.c.bf16 %v878_v48, %v878_v48 }
 0x214   : > { %v2540_v51 = vpack.c.b16 %v911_v50, %v911_v50 }
 0x215   : > { %v876_v47 = vpop.f32.mrf.mxu0 }
 0x218   : > { %890 = vrot.lane.b32.xlu1 %v875_v46, %s2164_s3 }
 0x220   : > { %883 = vrot.lane.b32.xlu1 %v878_v48, %s2163_s14 }
 0x228   : > { %913 = vrot.lane.b32.xlu1 %v2540_v51, %s2165_s8 }
 0x230   : > { %886 = vrot.lane.b32.xlu1 %v878_v48, %s2162_s27 }
 0x26a   : > { %v897_v58 = vpop.permute.xlu2 %896 }
 0x26b   : > { %v906_v60 = vpack.c.bf16 %v897_v58, %v897_v58 }
 0x26d   : > { %v984_v63 = vunpack.c.l.b16 %v906_v60 }
 0x26f   : > { %v985_v0 = vpack.c.b16 %v984_v63, %v984_v63 }
 0x282   : > { %v894_v52 = vpop.permute.xlu1 %893 }
 0x283   : > { %v905_v53 = vpack.c.bf16 %v894_v52, %v894_v52 }
 0x285   : > { %v960_v54 = vunpack.c.l.b16 %v905_v53 }
 0x287   : > { %v961_v55 = vpack.c.b16 %v960_v54, %v960_v54 }
 0x289   : > { %962 = vrot.lane.b32.xlu2 %v961_v55, %s2165_s8 }
 0x28a   : > { %v891_v56 = vpop.permute.xlu1 %890 }
 0x28b   : > { %v904_v57 = vpack.c.bf16 %v891_v56, %v891_v56 }
 0x28d   : > { %v936_v59 = vunpack.c.l.b16 %v904_v57 }
 0x28f   : > { %v937_v61 = vpack.c.b16 %v936_v59, %v936_v59 }
 0x291   : > { %938 = vrot.lane.b32.xlu0 %v937_v61, %s2165_s8  ;;  %880 = vrot.lane.b32.xlu2 %v878_v48, %s2164_s3 }
 0x292   : > { %v884_v62 = vpop.permute.xlu1 %883 }
 0x293   : > { %v901_v7 = vpack.c.bf16 %v884_v62, %v884_v62 }
 0x299   : > { %986 = vrot.lane.b32.xlu2 %v985_v0, %s2165_s8 }
 0x29a   : > { %v914_v2 = vpop.permute.xlu1 %913 }
 0x29b   : > { %v920_v3 = vsel %vm915_vm6, %v914_v2, 0 }
 0x29c   : > { %929 = vmatpush.bf16.xpose.msra.mxu1 %v920_v3 }
 0x2a1   : > { %1090 = vrot.lane.b32.xlu2 %v961_v55, %s2166_s13 }
 0x2a2   : > { %v887_v12 = vpop.permute.xlu1 %886 }
 0x2a3   : > { %1653 = vmatmul.msk.bf16.vlgmr.msra.gmra.mxu1 %vm915_vm6, %v899_v4  ;;  %v902_v13 = vpack.c.bf16 %v887_v12, %v887_v12  ;;  %v1142_v4 = vld [vmem:[%s2480_s22 + $0x8] sm:$0xf] }
 0x2e3   : > { %v963_v5 = vpop.permute.xlu2 %962 }
 0x2e4   : > { %v968_v6 = vsel %vm915_vm6, %v963_v5, 0  ;;  %v1189_v5 = vsel %vm1052_vm7, %v1142_v4, 0 }
 0x2e5   : > { %977 = vmatpush.bf16.xpose.msra.mxu3 %v968_v6  ;;  %v1143_v6 = vld [vmem:[%s2480_s22 + $0xc] sm:$0xf] }
 0x2eb   : > { %v881_v8 = vpop.permute.xlu2 %880 }
 0x2ec   : > { %1655 = vmatmul.msk.bf16.vlgmr.msra.gmra.mxu3 %vm915_vm6, %v901_v7  ;;  %v900_v18 = vpack.c.bf16 %v881_v8, %v881_v8  ;;  %v1210_v7 = vsel %vm1052_vm7, %v1143_v6, 0 }
 0x2f3   : > { %v987_v10 = vpop.permute.xlu2 %986 }
 0x2f4   : > { %v992_v11 = vsel %vm915_vm6, %v987_v10, 0 }
 0x2f5   : > { %1001 = vmatpush.bf16.xpose.msrb.mxu0 %v992_v11 }
 0x2fb   : > { %v1091_v14 = vpop.permute.xlu2 %1090 }
 0x2fc   : > { %1656 = vmatmul.msk.bf16.vlgmr.msrb.gmra.mxu0 %vm915_vm6, %v902_v13  ;;  %v1096_v15 = vsel %vm1052_vm7, %v1091_v14, 0  ;;  %v1141_v14 = vld [vmem:[%s2480_s22 + $0x4] sm:$0xf] }
 0x2fd   : > { %1105 = vmatpush.bf16.msrb.mxu3 %v1096_v15 }
 0x301   : > { %1198 = vmatpush.bf16.msra.mxu3 %v1189_v5 }
 0x303   : > { %v939_v16 = vpop.permute.xlu0 %938 }
 0x304   : > { %v944_v17 = vsel %vm915_vm6, %v939_v16, 0  ;;  %v1150_v16 = vsel %vm1052_vm7, %v1141_v14, 0 }
 0x305   : > { %953 = vmatpush.bf16.xpose.msra.mxu2 %v944_v17 }
 0x30c   : > { %1654 = vmatmul.msk.bf16.vlgmr.msra.gmra.mxu2 %vm915_vm6, %v900_v18 }
 0x320   : > { %v931_v20 = vpop.f32.mrf.mxu1 }
 0x321   : > { %v932_v21 = vadd.f32 %v1840_v19, %v931_v20 }
 0x323   : > { %v1007_v22 = vsel %vm915_vm6, %v932_v21, -inf }
 0x324   : > { %1008 = vmax.xlane.f32.xlu0 %v1007_v22 }
 0x328   : > { %v933_v24 = vpop.f32.mrf.mxu1 }
 0x329   : > { %v1140_v24 = vld [vmem:[%s2480_s22] sm:$0xf] }
 0x36f   : > { %v979_v25 = vpop.f32.mrf.mxu3 }
 0x370   : > { %v980_v26 = vadd.f32 %v1840_v19, %v979_v25  ;;  %v1169_v25 = vsel %vm1052_vm7, %v1140_v24, 0 }
 0x372   : > { %v1013_v27 = vsel %vm915_vm6, %v980_v26, -inf }
 0x373   : > { %1014 = vmax.xlane.f32.xlu2 %v1013_v27 }
 0x377   : > { %v981_v28 = vpop.f32.mrf.mxu3 }
 0x379   : > { %v1003_v29 = vpop.f32.mrf.mxu0 }
 0x37a   : > { %v1004_v30 = vadd.f32 %v1840_v19, %v1003_v29 }
 0x37c   : > { %v1016_v31 = vsel %vm915_vm6, %v1004_v30, -inf }
 0x37d   : > { %1017 = vmax.xlane.f32.xlu0 %v1016_v31 }
 0x381   : > { %v1005_v32 = vpop.f32.mrf.mxu0 }
 0x38b   : > { %1111 = vrot.lane.b32.xlu2 %v985_v0, %s2166_s13 }
 0x38f   : > { %v955_v33 = vpop.f32.mrf.mxu2 }
 0x390   : > { %v956_v34 = vadd.f32 %v1840_v19, %v955_v33 }
 0x391   : > { %1069 = vrot.lane.b32.xlu0 %v937_v61, %s2166_s13 }
 0x392   : > { %v1010_v35 = vsel %vm915_vm6, %v956_v34, -inf }
 0x393   : > { %1011 = vmax.xlane.f32.xlu1 %v1010_v35 }
 0x397   : > { %v957_v36 = vpop.f32.mrf.mxu2  ;;  %v1009_v37 = vpop.xlane.xlu0 %1008 }
 0x398   : > { %v1019_v38 = vsub.f32 %v932_v21, %v1009_v37 }
 0x39a   : > { %v1023_v39 = vmul.f32 1.442695, %v1019_v38 }
 0x39c   : > { %1854 = vpow2.f32 %v1023_v39 }
 0x3a2   : > { %v1855_v40 = vpop.eup %1854 }
 0x3a3   : > { %v1031_v41 = vsel %vm915_vm6, %v1855_v40, 0.0  ;;  %v1043_v3 = vpack.c.bf16 %v1855_v40, %v1855_v40 }
 0x3ac   : > { %1047 = vrot.lane.b32.xlu1 %v2540_v51, %s2166_s13 }
 0x3b4   : > { %1032 = vadd.xlane.f32.xlu2 %v1031_v41 }
 0x3e6   : > { %v1015_v42 = vpop.xlane.xlu2 %1014 }
 0x3e7   : > { %v1021_v43 = vsub.f32 %v980_v26, %v1015_v42 }
 0x3e9   : > { %v1027_v44 = vmul.f32 1.442695, %v1021_v43 }
 0x3eb   : > { %1856 = vpow2.f32 %v1027_v44 }
 0x3ee   : > { %v1112_v45 = vpop.permute.xlu2 %1111 }
 0x3ef   : > { %v1117_v46 = vsel %vm1052_vm7, %v1112_v45, 0 }
 0x3f0   : > { %1126 = vmatpush.bf16.msra.mxu0 %v1117_v46  ;;  %v1018_v47 = vpop.xlane.xlu0 %1017 }
 0x3f1   : > { %v1857_v48 = vpop.eup %1856  ;;  %v1022_v49 = vsub.f32 %v1004_v30, %v1018_v47  ;;  %v1841_v47 = vld [vmem:[%s2775_s20] ss:$0 sm:$0xff] }
 0x3f2   : > { %v1037_v50 = vsel %vm915_vm6, %v1857_v48, 0.0  ;;  %v1045_v52 = vpack.c.bf16 %v1857_v48, %v1857_v48 }
 0x3f3   : > { %v1029_v53 = vmul.f32 1.442695, %v1022_v49  ;;  %1038 = vadd.xlane.f32.xlu0 %v1037_v50 }
 0x3f4   : > { %1659 = vmatmul.msk.bf16.vlgmr.msrb.gmra.mxu3 %vm915_vm6, %v1045_v52  ;;  %1219 = vmatpush.bf16.msrb.mxu0 %v1210_v7 }
 0x3f5   : > { %1858 = vpow2.f32 %v1029_v53 }
 0x3fb   : > { %v1859_v51 = vpop.eup %1858 }
 0x3fc   : > { %v1046_v54 = vpack.c.bf16 %v1859_v51, %v1859_v51  ;;  %v1040_v55 = vsel %vm915_vm6, %v1859_v51, 0.0 }
 0x3fd   : > { %1041 = vadd.xlane.f32.xlu2 %v1040_v55 }
 0x3fe   : > { %1660 = vmatmul.msk.bf16.vlgmr.msra.gmra.mxu0 %vm915_vm6, %v1046_v54 }
 0x403   : > { %v1070_v56 = vpop.permute.xlu0 %1069 }
 0x404   : > { %v1075_v57 = vsel %vm1052_vm7, %v1070_v56, 0 }
 0x405   : > { %1084 = vmatpush.bf16.msrb.mxu2 %v1075_v57 }
 0x406   : > { %v1012_v58 = vpop.xlane.xlu1 %1011 }
 0x407   : > { %v1020_v59 = vsub.f32 %v956_v34, %v1012_v58  ;;  %v1703_v58 = vld [vmem:[%s2493_s26 + $0x8] sm:$0xff] }
 0x409   : > { %v1025_v60 = vmul.f32 1.442695, %v1020_v59  ;;  %1178 = vmatpush.bf16.msra.mxu2 %v1169_v25  ;;  %v1702_v59 = vld [vmem:[%s2493_s26] sm:$0xff] }
 0x40b   : > { %1860 = vpow2.f32 %v1025_v60 }
 0x411   : > { %v1861_v61 = vpop.eup %1860 }
 0x412   : > { %v1034_v62 = vsel %vm915_vm6, %v1861_v61, 0.0  ;;  %v1044_v63 = vpack.c.bf16 %v1861_v61, %v1861_v61  ;;  %v1707_v61 = vld [vmem:[%s2507_s29 + $0x18] sm:$0xff] }
 0x413   : > { %1035 = vadd.xlane.f32.xlu1 %v1034_v62 }
 0x414   : > { %1658 = vmatmul.msk.bf16.vlgmr.msrb.gmra.mxu2 %vm915_vm6, %v1044_v63  ;;  %v1706_v63 = vld [vmem:[%s2507_s29 + $0x10] sm:$0xff] }
 0x415   : > { %1350 = vmatpush.bf16.msrb.mxu2 %v1707_v61 }
 0x419   : > { %1351 = vmatpush.bf16.msrb.mxu2 %v1706_v63 }
 0x41e   : > { %v1048_v0 = vpop.permute.xlu1 %1047 }
 0x41f   : > { %v1054_v2 = vsel %vm1052_vm7, %v1048_v0, 0 }
 0x420   : > { %1063 = vmatpush.bf16.msrb.mxu1 %v1054_v2 }
 0x423   : > { %1657 = vmatmul.msk.bf16.vlgmr.msrb.gmra.mxu1 %vm915_vm6, %v1043_v3 }
 0x424   : > { %1159 = vmatpush.bf16.msra.mxu1 %v1150_v16 }
 0x427   : > { %v1033_v8 = vpop.xlane.xlu2 %1032 }
 0x428   : > { %1297 = vmatpush.bf16.msrb.mxu1 %v1703_v58 }
 0x42c   : > { %1298 = vmatpush.bf16.msrb.mxu1 %v1702_v59 }
 0x466   : > { %v1039_v10 = vpop.xlane.xlu0 %1038 }
 0x467   : > { %1862 = vrcp.f32 %v1039_v10  ;;  %v1842_v10 = vld [vmem:[%s764_s2] ss:$0 sm:$0xff] }
 0x46d   : > { %v1863_v12 = vpop.eup %1862 }
 0x470   : > { %v1042_v11 = vpop.xlane.xlu2 %1041 }
 0x471   : > { %1864 = vrcp.f32 %v1042_v11 }
 0x477   : > { %v1107_v13 = vpop.f32.mrf.mxu3  ;;  %v1865_v18 = vpop.eup %1864 }
 0x478   : > { %v1138_v15 = vmul.f32 %v1863_v12, %v1107_v13  ;;  %v1843_v12 = vld [vmem:[%s649_s0] ss:$0 sm:$0xff] }
 0x47a   : > { %v1184_v17 = vpack.c.bf16 %v1138_v15, %v1138_v15 }
 0x47b   : > { %v1128_v19 = vpop.f32.mrf.mxu0 }
 0x47c   : > { %v1139_v20 = vmul.f32 %v1865_v18, %v1128_v19  ;;  %1663 = vmatmul.msk.bf16.vlgmr.msra.gmra.mxu3 %vm915_vm6, %v1184_v17  ;;  %v1705_v17 = vld [vmem:[%s2507_s29 + $0x8] sm:$0xff]  ;;  %v1704_v18 = vld [vmem:[%s2507_s29] sm:$0xff]  ;;  %s2779_s29 = sld [smem:[#allocation22_spill]] }
 0x47d   : > { %1352 = vmatpush.bf16.msrb.mxu2 %v1705_v17  ;;  %v1844_v19 = vld [vmem:[%s772_s9] ss:$0 sm:$0xff] }
 0x47e   : > { %v1205_v21 = vpack.c.bf16 %v1139_v20, %v1139_v20 }
 0x47f   : > { %v1109_v22 = vpop.f32.mrf.mxu3 }
 0x480   : > { %1664 = vmatmul.msk.bf16.vlgmr.msrb.gmra.mxu0 %vm915_vm6, %v1205_v21 }
 0x481   : > { %1353 = vmatpush.bf16.msrb.mxu2 %v1704_v18 }
 0x482   : > { %p1691_p8 = scmp.ne.s32.totalorder %s2779_s29, 1 }
 0x483   : > { %v1130_v26 = vpop.f32.mrf.mxu0 }
 0x484   : > { %v1845_v26 = vld [vmem:[%s780_s17] ss:$0 sm:$0xff] }
 0x486   : > { %v1036_v27 = vpop.xlane.xlu1 %1035 }
 0x487   : > { %1866 = vrcp.f32 %v1036_v27 }
 0x488   : > { %1868 = vrcp.f32 %v1033_v8 }
 0x48d   : > { %v1867_v28 = vpop.eup %1866 }
 0x48e   : > { %v1869_v33 = vpop.eup %1868 }
 0x497   : > { %v1086_v29 = vpop.f32.mrf.mxu2 }
 0x498   : > { %v1137_v30 = vmul.f32 %v1867_v28, %v1086_v29 }
 0x49a   : > { %v1145_v31 = vpack.c.bf16 %v1137_v30, %v1137_v30 }
 0x49c   : > { %1661 = vmatmul.msk.bf16.vlgmr.msra.gmra.mxu1 %vm915_vm6, %v1145_v31 }
 0x49f   : > { %v1088_v32 = vpop.f32.mrf.mxu2 }
 0x4a0   : > { %v1065_v34 = vpop.f32.mrf.mxu1 }
 0x4a1   : > { %v1136_v35 = vmul.f32 %v1869_v33, %v1065_v34 }
 0x4a3   : > { %v1144_v36 = vpack.c.bf16 %v1136_v35, %v1136_v35 }
 0x4a5   : > { %1662 = vmatmul.msk.bf16.vlgmr.msra.gmra.mxu2 %vm915_vm6, %v1144_v36 }
 0x4a8   : > { %v1067_v37 = vpop.f32.mrf.mxu1 }
 0x4fd   : > { %v1221_v38 = vpop.f32.mrf.mxu0 }
 0x4ff   : > { %v1200_v39 = vpop.f32.mrf.mxu3 }
 0x505   : > { %v1223_v40 = vpop.f32.mrf.mxu0 }
 0x507   : > { %v1202_v41 = vpop.f32.mrf.mxu3 }
 0x519   : > { %v1161_v42 = vpop.f32.mrf.mxu1 }
 0x521   : > { %v1163_v43 = vpop.f32.mrf.mxu1 }
 0x528   : > { %v1180_v44 = vpop.f32.mrf.mxu2 }
 0x529   : > { %v1181_v45 = vadd.f32 %v1180_v44, %v1161_v42 }
 0x52b   : > { %v1204_v46 = vadd.f32 %v1200_v39, %v1181_v45 }
 0x52d   : > { %v1225_v48 = vadd.f32 %v1221_v38, %v1204_v46 }
 0x52f   : > { %v1230_v49 = vadd.f32 %v1841_v47, %v1225_v48 }
 0x530   : > { %v1182_v50 = vpop.f32.mrf.mxu2 }
 0x531   : > { %v1231_v52 = vadd.f32 %v1230_v49, %v2516_v1 }
 0x533   : > { %v1234_v53 = vsel %vm793_vm1, %v1231_v52, 0.0 }
 0x534   : > { %1235 = vadd.xlane.f32.xlu0 %v1234_v53 }
 0x5a7   : > { %v1236_v51 = vpop.xlane.xlu0 %1235 }
 0x5a8   : > { %v1237_v54 = vmul.f32 %v1236_v51, %v2520_v9 }
 0x5aa   : > { %v1238_v55 = vsub.f32 %v1231_v52, %v1237_v54 }
 0x5ac   : > { %v1239_v56 = vmul.f32 %v1238_v55, %v1238_v55  ;;  %v1261_v11 = vmul.f32 %v1842_v10, %v1238_v55 }
 0x5ae   : > { %v1240_v57 = vsel %vm793_vm1, %v1239_v56, 0.0 }
 0x5af   : > { %1241 = vadd.xlane.f32.xlu1 %v1240_v57 }
 0x622   : > { %v1242_v60 = vpop.xlane.xlu1 %1241 }
 0x623   : > { %v1243_v1 = vmul.f32 %v1242_v60, %v2527_v23 }
 0x625   : > { %1870 = vrsqrt.f32 %v1243_v1  ;;  %vm1251_vm8 = vcmp.eq.f32.partialorder %v1243_v1, inf  ;;  %v1254_v6 = vand.u32 2147483648, %v1243_v1  ;;  %vm1253_vm9 = vcmp.eq.f32.partialorder %v1243_v1, 0.0 }
 0x62b   : > { %v1871_v62 = vpop.eup %1870 }
 0x62c   : > { %v1245_v0 = vmul.f32 %v1871_v62, %v1243_v1 }
 0x62e   : > { %v1246_v9 = vmul.f32 %v1871_v62, %v1245_v0 }
 0x630   : > { %v1247_v2 = vmul.f32 0.5, %v1246_v9 }
 0x632   : > { %v1248_v3 = vsub.f32 1.5, %v1247_v2 }
 0x634   : > { %v1249_v4 = vmul.f32 %v1871_v62, %v1248_v3 }
 0x636   : > { %v1250_v5 = vmul.f32 %v1249_v4, %v1243_v1 }
 0x638   : > { %v1252_v7 = vsel %vm1251_vm8, %v1243_v1, %v1250_v5 }
 0x639   : > { %v1255_v23 = vsel %vm1253_vm9, %v1254_v6, %v1252_v7 }
 0x63a   : > { %v1256_v8 = vadd.f32 1e-06, %v1255_v23 }
 0x63c   : > { %1872 = vrcp.f32 %v1256_v8 }
 0x642   : > { %v1873_v13 = vpop.eup %1872 }
 0x643   : > { %v1262_v14 = vmul.f32 %v1873_v13, %v1261_v11 }
 0x645   : > { %v1266_v15 = vadd.f32 %v1843_v12, %v1262_v14 }
 0x647   : > { %v1267_v16 = vpack.c.bf16 %v1266_v15, %v1266_v15 }
 0x649   : > { %1673 = vmatmul.msk.bf16.vlgmr.msrb.gmra.mxu1 %vm793_vm1, %v1267_v16 }
 0x6c6   : > { %v1300_v20 = vpop.f32.mrf.mxu1 }
 0x6c7   : > { %v1301_v21 = vadd.f32 %v1844_v19, %v1300_v20 }
 0x6c9   : > { %v1304_v22 = vmax.f32 %v1301_v21, 0.0 }
 0x6cb   : > { %v1305_v24 = vpack.c.bf16 %v1304_v22, %v1304_v22 }
 0x6cd   : > { %1690 = vmatmul.msk.bf16.vlgmr.msrb.gmra.mxu2 %vm1342_vm10, %v1305_v24 }
 0x6ce   : > { %v1302_v25 = vpop.f32.mrf.mxu1 }
 0x750   : > { %v1355_v27 = vpop.f32.mrf.mxu2 }
 0x751   : > { %v1356_v28 = vadd.f32 %v1845_v26, %v1355_v27 }
 0x753   : > { %v1359_v29 = vadd.f32 %v1356_v28, %v1231_v52 }
 0x754   : > { %1364 = sbr.rel (%p1691_p8) target bundleno = 1882 (0x75a), region = 104 }
 0x755   : > { %1360 = vst.msk [vmem:[#allocation2] sm:$0xff] %vm793_vm1, %v1359_v29 }
 0x758   : > { %v1357_v30 = vpop.f32.mrf.mxu2 }
 0x759   : > { %1365 = vst.msk [vmem:[%s2512_s12] sm:$0xff] %vm793_vm1, %v1359_v29 }
 0x75a PF: > { %s2780_s9 = sld [smem:[#allocation23_spill]]  ;;  %s1379_s27 = sshll.u32 %s2512_s12, 4  ;;  %s1380_s27 = int_to_ptr.vmem [resolvable:$true] %s1379_s27 }
 0x75b   : > { %s2781_s28 = sld [smem:[#allocation26_spill]]  ;;  %s1367_s3 = scalar_lea.sflag [#allocation5], %s2432_s4 }
 0x75c   : > { %s2782_s6 = sld [smem:[#allocation47_spill]] }
 0x760   : > { %s1693_s19 = sshll.u32 %s2780_s9, 3 }
 0x761   : > { %p2783_p10 = scmp.ne.s32.totalorder %s2781_s28, 0 }
 0x762   : > { %s1377_s5 = scalar_lea.hbm %s2782_s6, %s1693_s19  ;;  %s2044_s15 = scalar_lea.hbm %s2782_s6, 16 }
 0x763   : > { %s1381_s14 = sshll.u32 %s1377_s5, 4  ;;  %s1382_s14 = int_to_ptr.hbm [resolvable:$true] %s1381_s14 }
 0x764   : > { %s2038_s8 = sshra.s32 %s1382_s14, 4  ;;  %s2039_s8 = int_to_ptr.hbm [resolvable:$true] %s2038_s8 }
 0x765   : > { %s2040_s13 = scalar_lea.hbm %s2039_s8, 8  ;;  %p2045_p2 = scmp.lt.s32.totalorder %s2039_s8, %s2782_s6 }
 0x766   : > { %p2041_p9 = scmp.ne.s32.totalorder %s2039_s8, %s2040_s13  ;;  %p2046_p4 = scmp.lt.s32.totalorder %s2044_s15, %s2040_s13 }
 0x768   : > { %p2042_p11 = pnand %p2041_p9, %p2783_p10  ;;  %p2047_p5 = por %p2046_p4, %p2045_p2 }
 0x76a   : > { %p2043_p0 = pneg %p2042_p11 }
 0x76c   : > { %p2048_p7 = pnand %p2047_p5, %p2043_p0 }
 0x76e   : > { %2051 = shalt.err (!%p2048_p7)
}
 0x76f   : > { %1718 = dma.vmem_to_hbm [thread:$0]  (%p2783_p10), %s1380_s27, 128, %s1382_s14, %s1367_s3  }
 0x770 PF: > { %s2784_s4 = sld [smem:[#allocation19_spill]]  ;;  %p1741_p12 = scmp.ge.s32.totalorder %s2158_s23, 2 }
 0x771   : > { %s2785_s12 = sld [smem:[#allocation27_spill]] }
 0x776   : > { %s1393_s26 = sand.u32 1, %s2784_s4  }
 0x777   : > { %p2786_p13 = scmp.ne.s32.totalorder %s2785_s12, 0  ;;  %s1394_s25 = scalar_lea.sflag [#allocation5], %s1393_s26 }
 0x779   : > { %p1737_p1 = pnand %p1741_p12, %p2786_p13 }
 0x77b   : > { %p1738_p3 = pneg %p1737_p1 }
 0x77d   : > { %2113 = dma.done.wait (%p1738_p3), %s1394_s25, 128  }
 0x77e   : > { %2115 = vsyncadd (%p1738_p3), %s1394_s25, 4294967168  ;;  %s36_s23 = sadd.s32 1, %s2158_s23   ;;  %s2787_s24 = sld [smem:[#allocation18_spill]] }
 0x77f   : > { %p33_p6 = scmp.ge.s32.totalorder %s36_s23, 6   ;;  %s2788_s15 = sld [smem:[#allocation31_spill]] }
 0x780   : > { %s2789_s16 = sld [smem:[#allocation20_spill]]  ;;  %s2796_s29 = smov %s2122_s30 }
 0x781   : > { %s2790_s17 = sld [smem:[#allocation21_spill]] }
 0x782   : > { %s2791_s18 = sld [smem:[#allocation32_spill]]  ;;  %35 = sbr.rel (!%p33_p6) target bundleno = 29 (0x1d), region = 204 }
 0x783   : > { %s2792_s19 = sld [smem:[#allocation24_spill]] }
 0x784   : > { %s2793_s20 = sld [smem:[#allocation25_spill]]  ;;  %s2797_s30 = smov %s2787_s24 }
 0x785   : > { %s2794_s21 = sld [smem:[#allocation28_spill]] }
 0x786   : > { %s2795_s22 = sld [smem:[#allocation30_spill]] }
 0x787   :  { %1400 = vsyncpa [#allocation4], 1 }
 0x788   :  { %1402 = vsyncpa [#allocation4 + $0x1], 1 }
 0x789   :  { %1403 = vsyncpa [#allocation7], 1 }
 0x78a   :  { %1405 = vsyncpa [#allocation7 + $0x1], 1 }
 0x78b   :  { %1406 = vsyncpa [#allocation10], 1 }
 0x78c   :  { %1408 = vsyncpa [#allocation10 + $0x1], 1 }
 0x78d   :  { %1409 = vsyncpa [#allocation5], 1 }
 0x78e   :  { %1411 = vsyncpa [#allocation5 + $0x1], 1 }

</bundles_post_ra>
